<compile_context>
chip_gen: v5e
topology: v5e:2x2
jax: 0.10.0
libtpu: 0.0.40
codegen_flags: <defaults>
</compile_context>

<pallas_src>
import jax
import jax.numpy as jnp
import numpy as np
from jax.experimental import pallas as pl
from jax.experimental.pallas import tpu as pltpu

LANE = 128      # TPU lane width
SUBLANE = 8     # TPU sublane width


def _round_up(x, m):
    return (x + m - 1) // m * m


def _largest_divisor_leq(n, cap):
    t = min(n, cap)
    while n % t != 0:
        t -= 1
    return t


def make_rnn_kernel(num_layers, t_blk):
    """Multi-layer tanh-RNN over a (t_blk, b_blk, Hp) time block.

    Grid = (batch blocks [parallel], time blocks [arbitrary]).  Per-layer
    hidden states are carried across time blocks directly in hid_ref (its
    block index is constant over the time axis, so it stays VMEM-resident).
    """
    L = num_layers

    def kernel(x_ref, b_ref, w_hbm_ref, out_ref, hid_ref, w_vmem, w_sem):
        # x_ref:     (t_blk, b_blk, Hp)  layer-0 input block (lane padded)
        # b_ref:     (L, 1, Hp)          fused bias (b_ih + b_hh), f32
        # w_hbm_ref: (L, 2, Hp, Hp)      HBM weights: [W_ih, W_hh] per layer
        # out_ref:   (t_blk, b_blk, Hp)  last-layer output per timestep
        # hid_ref:   (L, b_blk, Hp)      hidden carry / final hidden output
        # w_vmem:    (L, 2, Hp, Hp)      single-buffered weight staging
        # w_sem:     DMA semaphore for the weight staging copy
        ti = pl.program_id(1)
        b_blk, hp = hid_ref.shape[1], hid_ref.shape[2]

        # Stage the grid-invariant weights once per batch block (single
        # buffer) and reset the hidden carry for this batch block.
        @pl.when(ti == 0)
        def _():
            cp = pltpu.make_async_copy(w_hbm_ref, w_vmem, w_sem)
            cp.start()
            cp.wait()
            hid_ref[...] = jnp.zeros_like(hid_ref)

        # Hoist the bias broadcast out of the unrolled time loop.
        biases = [jnp.broadcast_to(b_ref[l], (b_blk, hp)) for l in range(L)]

        # Hidden state per layer (VMEM-resident output block acts as carry).
        hs = [hid_ref[l] for l in range(L)]

        # Wavefront schedule: wave w runs layer l on timestep t = w - l, so
        # consecutive layers issue independent MXU ops back-to-back instead of
        # serializing inside one timestep.  Weights are read from VMEM at the
        # dot site (no vreg hoist).
        pending = [None] * L      # pending[l]: layer l-1 output awaiting layer l
        for wave in range(t_blk + L - 1):
            nxt = [None] * L
            for l in range(L):
                t = wave - l
                if t < 0 or t >= t_blk:
                    continue
                inp = x_ref[t] if l == 0 else pending[l]
                pre = (
                    jnp.dot(inp, w_vmem[l, 0],
                            preferred_element_type=jnp.float32)
                    + jnp.dot(hs[l], w_vmem[l, 1],
                              preferred_element_type=jnp.float32)
                    + biases[l]
                )
                h_new = jnp.tanh(pre)                      # tanh kept in f32
                hs[l] = h_new.astype(hid_ref.dtype)
                if l + 1 < L:
                    nxt[l + 1] = hs[l]
                else:
                    out_ref[t] = h_new.astype(out_ref.dtype)
            pending = nxt

        # One store per layer per time block (carry + final-hidden output).
        for l in range(L):
            hid_ref[l] = hs[l]

    return kernel


def wrapper_rnn_forward(inputs_btd, weights, *, mask=None, t_blk=None,
                        b_blk=None, compute_dtype=jnp.float32):
    """inputs_btd: (B, T, input_size) float32 (batch_first).
    weights: list of (W_ih (D_in_l, H), W_hh (H, H), b (1, H)) per layer
             (b = b_ih + b_hh).
    Returns (output (B, T, H), hid (B, num_layers, H)) -- matches WrapperRNN."""
    if mask is not None:
        # TODO(synk): pack_padded_sequence sort/unsort path not implemented.
        raise NotImplementedError("mask path not implemented")

    B, T, D = inputs_btd.shape
    H = weights[0][0].shape[1]
    L = len(weights)

    Hp = _round_up(H, LANE)            # lane-dense hidden width
    assert D <= Hp, "input_size must fit in the lane-padded hidden width"
    Bp = _round_up(B, SUBLANE)         # sublane-dense batch

    # Bound the in-kernel unroll; the (arbitrary) time grid axis carries the
    # rest of the sequence.
    if t_blk is None:
        t_blk = _largest_divisor_leq(T, 32)
    # Keep the whole padded batch per block by default: more LHS rows per
    # weight push amortizes the MXU fill.  Only split (e.g. b_blk = Bp // 2,
    # sublane aligned) once each core would still get >= 64-256 rows — then
    # the "parallel" batch axis feeds both TensorCores on v7x.
    if b_blk is None:
        b_blk = Bp
    assert T % t_blk == 0 and Bp % b_blk == 0

    cdt = jnp.dtype(compute_dtype)

    # Time-major, pad batch -> Bp and feature -> Hp (zeros; sliced off below).
    x = jnp.transpose(inputs_btd, (1, 0, 2))                      # (T, B, D)
    x = jnp.pad(x, ((0, 0), (0, Bp - B), (0, Hp - D))).astype(cdt)

    # Pack per-layer weights as (L, 2, Hp, Hp): slot 0 acts on the layer
    # input, slot 1 on h_prev.  Zero padding keeps the padded lanes inert.
    Ws, Bs = [], []
    for (w_ih, w_hh, b) in weights:
        d_in = w_ih.shape[0]
        w = jnp.zeros((2, Hp, Hp), jnp.float32)
        w = w.at[0, :d_in, :H].set(w_ih)
        w = w.at[1, :H, :H].set(w_hh)
        Ws.append(w)
        Bs.append(jnp.zeros((1, Hp), jnp.float32).at[:, :H].set(b))
    w_cat = jnp.stack(Ws).astype(cdt)                             # (L,2,Hp,Hp)
    b_cat = jnp.stack(Bs)                                         # (L,1,Hp) f32

    # VMEM budget: in/out/hid blocks are double-buffered by the pipeline,
    # weights are single-buffered (manual staging).  Cap at 64 MiB (v7x).
    itemsize = cdt.itemsize
    blk_bytes = t_blk * b_blk * Hp * itemsize
    hid_bytes = L * b_blk * Hp * itemsize
    w_bytes = L * 2 * Hp * Hp * itemsize
    b_bytes = L * Hp * 4
    vmem_need = 2 * (2 * blk_bytes + hid_bytes + b_bytes) + w_bytes
    vmem_limit = int(min(max(2 * vmem_need, 16 * 1024 * 1024), 64 * 1024 * 1024))

    nb, nt = Bp // b_blk, T // t_blk

    out_tbh, hid_lbh = pl.pallas_call(
        make_rnn_kernel(L, t_blk),
        out_shape=[
            jax.ShapeDtypeStruct((T, Bp, Hp), cdt),
            jax.ShapeDtypeStruct((L, Bp, Hp), cdt),
        ],
        grid_spec=pltpu.PrefetchScalarGridSpec(
            num_scalar_prefetch=0,
            grid=(nb, nt),
            in_specs=[
                pl.BlockSpec((t_blk, b_blk, Hp), lambda bi, ti: (ti, bi, 0)),
                pl.BlockSpec((L, 1, Hp), lambda bi, ti: (0, 0, 0)),
                pl.BlockSpec(memory_space=pl.ANY),    # weights stay in HBM
            ],
            out_specs=[
                pl.BlockSpec((t_blk, b_blk, Hp), lambda bi, ti: (ti, bi, 0)),
                pl.BlockSpec((L, b_blk, Hp), lambda bi, ti: (0, bi, 0)),
            ],
            scratch_shapes=[
                pltpu.VMEM((L, 2, Hp, Hp), cdt),      # single-buffered weights
                pltpu.SemaphoreType.DMA,
            ],
        ),
        compiler_params=pltpu.CompilerParams(
            # batch blocks are independent (megacore-shardable); the time axis
            # carries the recurrence sequentially.
            dimension_semantics=("parallel", "arbitrary"),
            vmem_limit_bytes=vmem_limit,
        ),
    )(x, b_cat, w_cat)

    output = jnp.transpose(out_tbh[:, :B, :H], (1, 0, 2)).astype(jnp.float32)
    hid = jnp.transpose(hid_lbh[:, :B, :H], (1, 0, 2)).astype(jnp.float32)
    return output, hid                                  # hid == hid.permute(1,0,2)


def rnn_reference(inputs_btd, weights):
    """Pure-JAX reference (lax.scan) replicating nn.RNN(tanh) eval forward."""
    B, T, D = inputs_btd.shape
    H = weights[0][0].shape[1]
    x = inputs_btd
    hids = []
    for (wih, whh, b) in weights:
        def step(h, xt, wih=wih, whh=whh, b=b):
            h_new = jnp.tanh(xt @ wih + h @ whh + b[0])
            return h_new, h_new
        h0 = jnp.zeros((B, H), jnp.float32)
        h_last, ys = jax.lax.scan(step, h0, jnp.transpose(x, (1, 0, 2)))
        x = jnp.transpose(ys, (1, 0, 2))
        hids.append(h_last)
    return x, jnp.stack(hids, axis=1)


def init_weights(key, input_size, hidden_size, num_layers):
    """Deterministic init matching nn.RNN param shapes (biases pre-summed)."""
    weights = []
    bound = 1.0 / np.sqrt(hidden_size)
    for l in range(num_layers):
        d_in = input_size if l == 0 else hidden_size
        key, k1, k2, k3, k4 = jax.random.split(key, 5)
        w_ih = jax.random.uniform(k1, (d_in, hidden_size), jnp.float32, -bound, bound)
        w_hh = jax.random.uniform(k2, (hidden_size, hidden_size), jnp.float32, -bound, bound)
        b_ih = jax.random.uniform(k3, (hidden_size,), jnp.float32, -bound, bound)
        b_hh = jax.random.uniform(k4, (hidden_size,), jnp.float32, -bound, bound)
        weights.append((w_ih, w_hh, (b_ih + b_hh)[None, :]))
    return weights


if __name__ == "__main__":
    B, T, INPUT_SIZE, HIDDEN_SIZE, NUM_LAYERS = 4, 8, 32, 32, 2

    key = jax.random.PRNGKey(0)
    key, kx = jax.random.split(key)
    inputs = jax.random.normal(kx, (B, T, INPUT_SIZE), jnp.float32)
    weights = init_weights(key, INPUT_SIZE, HIDDEN_SIZE, NUM_LAYERS)

    ref_out, ref_hid = rnn_reference(inputs, weights)

    # f32 path (default): exact to 1e-5 against the reference.
    out, hid = wrapper_rnn_forward(inputs, weights)
    out = jax.block_until_ready(out)
    hid = jax.block_until_ready(hid)
    np.testing.assert_allclose(np.asarray(out), np.asarray(ref_out), rtol=1e-5, atol=1e-5)
    np.testing.assert_allclose(np.asarray(hid), np.asarray(ref_hid), rtol=1e-5, atol=1e-5)
    assert out.shape == (B, T, HIDDEN_SIZE)
    assert hid.shape == (B, NUM_LAYERS, HIDDEN_SIZE)

    # bf16 path (v6e/v7x MXU-native): same kernel, relaxed tolerance.
    out_bf, hid_bf = wrapper_rnn_forward(inputs, weights, compute_dtype=jnp.bfloat16)
    out_bf = jax.block_until_ready(out_bf)
    hid_bf = jax.block_until_ready(hid_bf)
    np.testing.assert_allclose(np.asarray(out_bf), np.asarray(ref_out), rtol=5e-2, atol=5e-2)
    np.testing.assert_allclose(np.asarray(hid_bf), np.asarray(ref_hid), rtol=5e-2, atol=5e-2)

    print("KERNEL_OK")
</pallas_src>

<mosaic_0001>
module attributes {stable_mosaic.version = 11 : i64} {
  func.func @kernel(%arg0: i32, %arg1: i32, %arg2: memref<8x8x128xf32, #tpu.memory_space<vmem>>, %arg3: memref<2x1x128xf32, #tpu.memory_space<vmem>>, %arg4: memref<2x2x128x128xf32, #tpu.memory_space<any>>, %arg5: memref<8x8x128xf32, #tpu.memory_space<vmem>>, %arg6: memref<2x8x128xf32, #tpu.memory_space<vmem>>, %arg7: memref<2x2x128x128xf32, #tpu.memory_space<vmem>>, %arg8: memref<!tpu.dma_semaphore, #tpu.memory_space<semaphore_mem>>) attributes {dimension_semantics = [#tpu.dimension_semantics<parallel>, #tpu.dimension_semantics<arbitrary>], iteration_bounds = array<i64: 1, 1>, scalar_prefetch = 0 : i64, scratch_operands = 2 : i64, tpu.core_type = #tpu.core_type<tc>, window_params = [{transform_indices = @transform_0, window_bounds = array<i64: 8, 8, 128>}, {pipeline_mode = #tpu.pipeline_mode<synchronous>, transform_indices = @transform_1, window_bounds = array<i64: 2, 1, 128>}, {}, {transform_indices = @transform_3, window_bounds = array<i64: 8, 8, 128>}, {transform_indices = @transform_4, window_bounds = array<i64: 2, 8, 128>}]} {
    %c0_i32 = arith.constant 0 : i32
    %0 = arith.cmpi eq, %arg1, %c0_i32 : i32
    %1 = arith.extui %0 : i1 to i32
    %c0_i32_0 = arith.constant 0 : i32
    %2 = arith.cmpi ne, %1, %c0_i32_0 : i32
    scf.if %2 {
      tpu.enqueue_dma source(%arg4 : memref<2x2x128x128xf32, #tpu.memory_space<any>>) target(%arg7 : memref<2x2x128x128xf32, #tpu.memory_space<vmem>>) target_semaphore(%arg8 : memref<!tpu.dma_semaphore, #tpu.memory_space<semaphore_mem>>)
      tpu.wait_dma2 semaphore(%arg8 : memref<!tpu.dma_semaphore, #tpu.memory_space<semaphore_mem>>) src(%arg4 : memref<2x2x128x128xf32, #tpu.memory_space<any>>) dst(%arg7 : memref<2x2x128x128xf32, #tpu.memory_space<vmem>>)
      %cst_218 = arith.constant 0.000000e+00 : f32
      %205 = vector.broadcast %cst_218 : f32 to vector<2x8x128xf32>
      %c0_219 = arith.constant 0 : index
      %c0_220 = arith.constant 0 : index
      %c0_221 = arith.constant 0 : index
      %206 = vector.load %arg6[%c0_219, %c0_220, %c0_221] : memref<2x8x128xf32, #tpu.memory_space<vmem>>, vector<2x8x128xf32>
      tpu.vector_store %arg6[%c0_219, %c0_220, %c0_221], %205 {strides = array<i32>} : memref<2x8x128xf32, #tpu.memory_space<vmem>>, vector<2x8x128xf32>,
    } else {
    }
    %c0 = arith.constant 0 : index
    %c0_1 = arith.constant 0 : index
    %c0_2 = arith.constant 0 : index
    %3 = vector.load %arg3[%c0, %c0_1, %c0_2] : memref<2x1x128xf32, #tpu.memory_space<vmem>>, vector<1x1x128xf32>
    %4 = vector.shape_cast %3 : vector<1x1x128xf32> to vector<1x128xf32>
    %5 = vector.shape_cast %4 : vector<1x128xf32> to vector<1x128xf32>
    %6 = vector.broadcast %5 : vector<1x128xf32> to vector<8x128xf32>
    %c1 = arith.constant 1 : index
    %c0_3 = arith.constant 0 : index
    %c0_4 = arith.constant 0 : index
    %7 = vector.load %arg3[%c1, %c0_3, %c0_4] : memref<2x1x128xf32, #tpu.memory_space<vmem>>, vector<1x1x128xf32>
    %8 = vector.shape_cast %7 : vector<1x1x128xf32> to vector<1x128xf32>
    %9 = vector.shape_cast %8 : vector<1x128xf32> to vector<1x128xf32>
    %10 = vector.broadcast %9 : vector<1x128xf32> to vector<8x128xf32>
    %c0_5 = arith.constant 0 : index
    %c0_6 = arith.constant 0 : index
    %c0_7 = arith.constant 0 : index
    %11 = vector.load %arg6[%c0_5, %c0_6, %c0_7] : memref<2x8x128xf32, #tpu.memory_space<vmem>>, vector<1x8x128xf32>
    %12 = vector.shape_cast %11 : vector<1x8x128xf32> to vector<8x128xf32>
    %c1_8 = arith.constant 1 : index
    %c0_9 = arith.constant 0 : index
    %c0_10 = arith.constant 0 : index
    %13 = vector.load %arg6[%c1_8, %c0_9, %c0_10] : memref<2x8x128xf32, #tpu.memory_space<vmem>>, vector<1x8x128xf32>
    %14 = vector.shape_cast %13 : vector<1x8x128xf32> to vector<8x128xf32>
    %c0_11 = arith.constant 0 : index
    %c0_12 = arith.constant 0 : index
    %c0_13 = arith.constant 0 : index
    %15 = vector.load %arg2[%c0_11, %c0_12, %c0_13] : memref<8x8x128xf32, #tpu.memory_space<vmem>>, vector<1x8x128xf32>
    %16 = vector.shape_cast %15 : vector<1x8x128xf32> to vector<8x128xf32>
    %c0_14 = arith.constant 0 : index
    %c0_15 = arith.constant 0 : index
    %c0_16 = arith.constant 0 : index
    %c0_17 = arith.constant 0 : index
    %17 = vector.load %arg7[%c0_14, %c0_15, %c0_16, %c0_17] : memref<2x2x128x128xf32, #tpu.memory_space<vmem>>, vector<1x1x128x128xf32>
    %18 = vector.shape_cast %17 : vector<1x1x128x128xf32> to vector<128x128xf32>
    %cst = arith.constant dense<0.000000e+00> : vector<8x128xf32>
    %19 = tpu.matmul %16, %18, %cst {dimension_numbers = #tpu.dot_dimension_numbers<[1], [0], [0], [1], [0, 0, 1, 1], [], []>} : vector<8x128xf32>, vector<128x128xf32>, vector<8x128xf32> -> vector<8x128xf32>
    %c0_18 = arith.constant 0 : index
    %c1_19 = arith.constant 1 : index
    %c0_20 = arith.constant 0 : index
    %c0_21 = arith.constant 0 : index
    %20 = vector.load %arg7[%c0_18, %c1_19, %c0_20, %c0_21] : memref<2x2x128x128xf32, #tpu.memory_space<vmem>>, vector<1x1x128x128xf32>
    %21 = vector.shape_cast %20 : vector<1x1x128x128xf32> to vector<128x128xf32>
    %cst_22 = arith.constant dense<0.000000e+00> : vector<8x128xf32>
    %22 = tpu.matmul %12, %21, %cst_22 {dimension_numbers = #tpu.dot_dimension_numbers<[1], [0], [0], [1], [0, 0, 1, 1], [], []>} : vector<8x128xf32>, vector<128x128xf32>, vector<8x128xf32> -> vector<8x128xf32>
    %23 = arith.addf %19, %22 : vector<8x128xf32>
    %24 = arith.addf %23, %6 : vector<8x128xf32>
    %25 = math.tanh %24 : vector<8x128xf32>
    %c1_23 = arith.constant 1 : index
    %c0_24 = arith.constant 0 : index
    %c0_25 = arith.constant 0 : index
    %26 = vector.load %arg2[%c1_23, %c0_24, %c0_25] : memref<8x8x128xf32, #tpu.memory_space<vmem>>, vector<1x8x128xf32>
    %27 = vector.shape_cast %26 : vector<1x8x128xf32> to vector<8x128xf32>
    %c0_26 = arith.constant 0 : index
    %c0_27 = arith.constant 0 : index
    %c0_28 = arith.constant 0 : index
    %c0_29 = arith.constant 0 : index
    %28 = vector.load %arg7[%c0_26, %c0_27, %c0_28, %c0_29] : memref<2x2x128x128xf32, #tpu.memory_space<vmem>>, vector<1x1x128x128xf32>
    %29 = vector.shape_cast %28 : vector<1x1x128x128xf32> to vector<128x128xf32>
    %cst_30 = arith.constant dense<0.000000e+00> : vector<8x128xf32>
    %30 = tpu.matmul %27, %29, %cst_30 {dimension_numbers = #tpu.dot_dimension_numbers<[1], [0], [0], [1], [0, 0, 1, 1], [], []>} : vector<8x128xf32>, vector<128x128xf32>, vector<8x128xf32> -> vector<8x128xf32>
    %c0_31 = arith.constant 0 : index
    %c1_32 = arith.constant 1 : index
    %c0_33 = arith.constant 0 : index
    %c0_34 = arith.constant 0 : index
    %31 = vector.load %arg7[%c0_31, %c1_32, %c0_33, %c0_34] : memref<2x2x128x128xf32, #tpu.memory_space<vmem>>, vector<1x1x128x128xf32>
    %32 = vector.shape_cast %31 : vector<1x1x128x128xf32> to vector<128x128xf32>
    %cst_35 = arith.constant dense<0.000000e+00> : vector<8x128xf32>
    %33 = tpu.matmul %25, %32, %cst_35 {dimension_numbers = #tpu.dot_dimension_numbers<[1], [0], [0], [1], [0, 0, 1, 1], [], []>} : vector<8x128xf32>, vector<128x128xf32>, vector<8x128xf32> -> vector<8x128xf32>
    %34 = arith.addf %30, %33 : vector<8x128xf32>
    %35 = arith.addf %34, %6 : vector<8x128xf32>
    %36 = math.tanh %35 : vector<8x128xf32>
    %c1_36 = arith.constant 1 : index
    %c0_37 = arith.constant 0 : index
    %c0_38 = arith.constant 0 : index
    %c0_39 = arith.constant 0 : index
    %37 = vector.load %arg7[%c1_36, %c0_37, %c0_38, %c0_39] : memref<2x2x128x128xf32, #tpu.memory_space<vmem>>, vector<1x1x128x128xf32>
    %38 = vector.shape_cast %37 : vector<1x1x128x128xf32> to vector<128x128xf32>
    %cst_40 = arith.constant dense<0.000000e+00> : vector<8x128xf32>
    %39 = tpu.matmul %25, %38, %cst_40 {dimension_numbers = #tpu.dot_dimension_numbers<[1], [0], [0], [1], [0, 0, 1, 1], [], []>} : vector<8x128xf32>, vector<128x128xf32>, vector<8x128xf32> -> vector<8x128xf32>
    %c1_41 = arith.constant 1 : index
    %c1_42 = arith.constant 1 : index
    %c0_43 = arith.constant 0 : index
    %c0_44 = arith.constant 0 : index
    %40 = vector.load %arg7[%c1_41, %c1_42, %c0_43, %c0_44] : memref<2x2x128x128xf32, #tpu.memory_space<vmem>>, vector<1x1x128x128xf32>
    %41 = vector.shape_cast %40 : vector<1x1x128x128xf32> to vector<128x128xf32>
    %cst_45 = arith.constant dense<0.000000e+00> : vector<8x128xf32>
    %42 = tpu.matmul %14, %41, %cst_45 {dimension_numbers = #tpu.dot_dimension_numbers<[1], [0], [0], [1], [0, 0, 1, 1], [], []>} : vector<8x128xf32>, vector<128x128xf32>, vector<8x128xf32> -> vector<8x128xf32>
    %43 = arith.addf %39, %42 : vector<8x128xf32>
    %44 = arith.addf %43, %10 : vector<8x128xf32>
    %45 = math.tanh %44 : vector<8x128xf32>
    %c0_46 = arith.constant 0 : index
    %c0_47 = arith.constant 0 : index
    %c0_48 = arith.constant 0 : index
    %46 = vector.load %arg5[%c0_46, %c0_47, %c0_48] : memref<8x8x128xf32, #tpu.memory_space<vmem>>, vector<1x8x128xf32>
    %47 = vector.shape_cast %46 : vector<1x8x128xf32> to vector<8x128xf32>
    %48 = vector.shape_cast %45 : vector<8x128xf32> to vector<1x8x128xf32>
    tpu.vector_store %arg5[%c0_46, %c0_47, %c0_48], %48 {strides = array<i32>} : memref<8x8x128xf32, #tpu.memory_space<vmem>>, vector<1x8x128xf32>,
    %c2 = arith.constant 2 : index
    %c0_49 = arith.constant 0 : index
    %c0_50 = arith.constant 0 : index
    %49 = vector.load %arg2[%c2, %c0_49, %c0_50] : memref<8x8x128xf32, #tpu.memory_space<vmem>>, vector<1x8x128xf32>
    %50 = vector.shape_cast %49 : vector<1x8x128xf32> to vector<8x128xf32>
    %c0_51 = arith.constant 0 : index
    %c0_52 = arith.constant 0 : index
    %c0_53 = arith.constant 0 : index
    %c0_54 = arith.constant 0 : index
    %51 = vector.load %arg7[%c0_51, %c0_52, %c0_53, %c0_54] : memref<2x2x128x128xf32, #tpu.memory_space<vmem>>, vector<1x1x128x128xf32>
    %52 = vector.shape_cast %51 : vector<1x1x128x128xf32> to vector<128x128xf32>
    %cst_55 = arith.constant dense<0.000000e+00> : vector<8x128xf32>
    %53 = tpu.matmul %50, %52, %cst_55 {dimension_numbers = #tpu.dot_dimension_numbers<[1], [0], [0], [1], [0, 0, 1, 1], [], []>} : vector<8x128xf32>, vector<128x128xf32>, vector<8x128xf32> -> vector<8x128xf32>
    %c0_56 = arith.constant 0 : index
    %c1_57 = arith.constant 1 : index
    %c0_58 = arith.constant 0 : index
    %c0_59 = arith.constant 0 : index
    %54 = vector.load %arg7[%c0_56, %c1_57, %c0_58, %c0_59] : memref<2x2x128x128xf32, #tpu.memory_space<vmem>>, vector<1x1x128x128xf32>
    %55 = vector.shape_cast %54 : vector<1x1x128x128xf32> to vector<128x128xf32>
    %cst_60 = arith.constant dense<0.000000e+00> : vector<8x128xf32>
    %56 = tpu.matmul %36, %55, %cst_60 {dimension_numbers = #tpu.dot_dimension_numbers<[1], [0], [0], [1], [0, 0, 1, 1], [], []>} : vector<8x128xf32>, vector<128x128xf32>, vector<8x128xf32> -> vector<8x128xf32>
    %57 = arith.addf %53, %56 : vector<8x128xf32>
    %58 = arith.addf %57, %6 : vector<8x128xf32>
    %59 = math.tanh %58 : vector<8x128xf32>
    %c1_61 = arith.constant 1 : index
    %c0_62 = arith.constant 0 : index
    %c0_63 = arith.constant 0 : index
    %c0_64 = arith.constant 0 : index
    %60 = vector.load %arg7[%c1_61, %c0_62, %c0_63, %c0_64] : memref<2x2x128x128xf32, #tpu.memory_space<vmem>>, vector<1x1x128x128xf32>
    %61 = vector.shape_cast %60 : vector<1x1x128x128xf32> to vector<128x128xf32>
    %cst_65 = arith.constant dense<0.000000e+00> : vector<8x128xf32>
    %62 = tpu.matmul %36, %61, %cst_65 {dimension_numbers = #tpu.dot_dimension_numbers<[1], [0], [0], [1], [0, 0, 1, 1], [], []>} : vector<8x128xf32>, vector<128x128xf32>, vector<8x128xf32> -> vector<8x128xf32>
    %c1_66 = arith.constant 1 : index
    %c1_67 = arith.constant 1 : index
    %c0_68 = arith.constant 0 : index
    %c0_69 = arith.constant 0 : index
    %63 = vector.load %arg7[%c1_66, %c1_67, %c0_68, %c0_69] : memref<2x2x128x128xf32, #tpu.memory_space<vmem>>, vector<1x1x128x128xf32>
    %64 = vector.shape_cast %63 : vector<1x1x128x128xf32> to vector<128x128xf32>
    %cst_70 = arith.constant dense<0.000000e+00> : vector<8x128xf32>
    %65 = tpu.matmul %45, %64, %cst_70 {dimension_numbers = #tpu.dot_dimension_numbers<[1], [0], [0], [1], [0, 0, 1, 1], [], []>} : vector<8x128xf32>, vector<128x128xf32>, vector<8x128xf32> -> vector<8x128xf32>
    %66 = arith.addf %62, %65 : vector<8x128xf32>
    %67 = arith.addf %66, %10 : vector<8x128xf32>
    %68 = math.tanh %67 : vector<8x128xf32>
    %c1_71 = arith.constant 1 : index
    %c0_72 = arith.constant 0 : index
    %c0_73 = arith.constant 0 : index
    %69 = vector.load %arg5[%c1_71, %c0_72, %c0_73] : memref<8x8x128xf32, #tpu.memory_space<vmem>>, vector<1x8x128xf32>
    %70 = vector.shape_cast %69 : vector<1x8x128xf32> to vector<8x128xf32>
    %71 = vector.shape_cast %68 : vector<8x128xf32> to vector<1x8x128xf32>
    tpu.vector_store %arg5[%c1_71, %c0_72, %c0_73], %71 {strides = array<i32>} : memref<8x8x128xf32, #tpu.memory_space<vmem>>, vector<1x8x128xf32>,
    %c3 = arith.constant 3 : index
    %c0_74 = arith.constant 0 : index
    %c0_75 = arith.constant 0 : index
    %72 = vector.load %arg2[%c3, %c0_74, %c0_75] : memref<8x8x128xf32, #tpu.memory_space<vmem>>, vector<1x8x128xf32>
    %73 = vector.shape_cast %72 : vector<1x8x128xf32> to vector<8x128xf32>
    %c0_76 = arith.constant 0 : index
    %c0_77 = arith.constant 0 : index
    %c0_78 = arith.constant 0 : index
    %c0_79 = arith.constant 0 : index
    %74 = vector.load %arg7[%c0_76, %c0_77, %c0_78, %c0_79] : memref<2x2x128x128xf32, #tpu.memory_space<vmem>>, vector<1x1x128x128xf32>
    %75 = vector.shape_cast %74 : vector<1x1x128x128xf32> to vector<128x128xf32>
    %cst_80 = arith.constant dense<0.000000e+00> : vector<8x128xf32>
    %76 = tpu.matmul %73, %75, %cst_80 {dimension_numbers = #tpu.dot_dimension_numbers<[1], [0], [0], [1], [0, 0, 1, 1], [], []>} : vector<8x128xf32>, vector<128x128xf32>, vector<8x128xf32> -> vector<8x128xf32>
    %c0_81 = arith.constant 0 : index
    %c1_82 = arith.constant 1 : index
    %c0_83 = arith.constant 0 : index
    %c0_84 = arith.constant 0 : index
    %77 = vector.load %arg7[%c0_81, %c1_82, %c0_83, %c0_84] : memref<2x2x128x128xf32, #tpu.memory_space<vmem>>, vector<1x1x128x128xf32>
    %78 = vector.shape_cast %77 : vector<1x1x128x128xf32> to vector<128x128xf32>
    %cst_85 = arith.constant dense<0.000000e+00> : vector<8x128xf32>
    %79 = tpu.matmul %59, %78, %cst_85 {dimension_numbers = #tpu.dot_dimension_numbers<[1], [0], [0], [1], [0, 0, 1, 1], [], []>} : vector<8x128xf32>, vector<128x128xf32>, vector<8x128xf32> -> vector<8x128xf32>
    %80 = arith.addf %76, %79 : vector<8x128xf32>
    %81 = arith.addf %80, %6 : vector<8x128xf32>
    %82 = math.tanh %81 : vector<8x128xf32>
    %c1_86 = arith.constant 1 : index
    %c0_87 = arith.constant 0 : index
    %c0_88 = arith.constant 0 : index
    %c0_89 = arith.constant 0 : index
    %83 = vector.load %arg7[%c1_86, %c0_87, %c0_88, %c0_89] : memref<2x2x128x128xf32, #tpu.memory_space<vmem>>, vector<1x1x128x128xf32>
    %84 = vector.shape_cast %83 : vector<1x1x128x128xf32> to vector<128x128xf32>
    %cst_90 = arith.constant dense<0.000000e+00> : vector<8x128xf32>
    %85 = tpu.matmul %59, %84, %cst_90 {dimension_numbers = #tpu.dot_dimension_numbers<[1], [0], [0], [1], [0, 0, 1, 1], [], []>} : vector<8x128xf32>, vector<128x128xf32>, vector<8x128xf32> -> vector<8x128xf32>
    %c1_91 = arith.constant 1 : index
    %c1_92 = arith.constant 1 : index
    %c0_93 = arith.constant 0 : index
    %c0_94 = arith.constant 0 : index
    %86 = vector.load %arg7[%c1_91, %c1_92, %c0_93, %c0_94] : memref<2x2x128x128xf32, #tpu.memory_space<vmem>>, vector<1x1x128x128xf32>
    %87 = vector.shape_cast %86 : vector<1x1x128x128xf32> to vector<128x128xf32>
    %cst_95 = arith.constant dense<0.000000e+00> : vector<8x128xf32>
    %88 = tpu.matmul %68, %87, %cst_95 {dimension_numbers = #tpu.dot_dimension_numbers<[1], [0], [0], [1], [0, 0, 1, 1], [], []>} : vector<8x128xf32>, vector<128x128xf32>, vector<8x128xf32> -> vector<8x128xf32>
    %89 = arith.addf %85, %88 : vector<8x128xf32>
    %90 = arith.addf %89, %10 : vector<8x128xf32>
    %91 = math.tanh %90 : vector<8x128xf32>
    %c2_96 = arith.constant 2 : index
    %c0_97 = arith.constant 0 : index
    %c0_98 = arith.constant 0 : index
    %92 = vector.load %arg5[%c2_96, %c0_97, %c0_98] : memref<8x8x128xf32, #tpu.memory_space<vmem>>, vector<1x8x128xf32>
    %93 = vector.shape_cast %92 : vector<1x8x128xf32> to vector<8x128xf32>
    %94 = vector.shape_cast %91 : vector<8x128xf32> to vector<1x8x128xf32>
    tpu.vector_store %arg5[%c2_96, %c0_97, %c0_98], %94 {strides = array<i32>} : memref<8x8x128xf32, #tpu.memory_space<vmem>>, vector<1x8x128xf32>,
    %c4 = arith.constant 4 : index
    %c0_99 = arith.constant 0 : index
    %c0_100 = arith.constant 0 : index
    %95 = vector.load %arg2[%c4, %c0_99, %c0_100] : memref<8x8x128xf32, #tpu.memory_space<vmem>>, vector<1x8x128xf32>
    %96 = vector.shape_cast %95 : vector<1x8x128xf32> to vector<8x128xf32>
    %c0_101 = arith.constant 0 : index
    %c0_102 = arith.constant 0 : index
    %c0_103 = arith.constant 0 : index
    %c0_104 = arith.constant 0 : index
    %97 = vector.load %arg7[%c0_101, %c0_102, %c0_103, %c0_104] : memref<2x2x128x128xf32, #tpu.memory_space<vmem>>, vector<1x1x128x128xf32>
    %98 = vector.shape_cast %97 : vector<1x1x128x128xf32> to vector<128x128xf32>
    %cst_105 = arith.constant dense<0.000000e+00> : vector<8x128xf32>
    %99 = tpu.matmul %96, %98, %cst_105 {dimension_numbers = #tpu.dot_dimension_numbers<[1], [0], [0], [1], [0, 0, 1, 1], [], []>} : vector<8x128xf32>, vector<128x128xf32>, vector<8x128xf32> -> vector<8x128xf32>
    %c0_106 = arith.constant 0 : index
    %c1_107 = arith.constant 1 : index
    %c0_108 = arith.constant 0 : index
    %c0_109 = arith.constant 0 : index
    %100 = vector.load %arg7[%c0_106, %c1_107, %c0_108, %c0_109] : memref<2x2x128x128xf32, #tpu.memory_space<vmem>>, vector<1x1x128x128xf32>
    %101 = vector.shape_cast %100 : vector<1x1x128x128xf32> to vector<128x128xf32>
    %cst_110 = arith.constant dense<0.000000e+00> : vector<8x128xf32>
    %102 = tpu.matmul %82, %101, %cst_110 {dimension_numbers = #tpu.dot_dimension_numbers<[1], [0], [0], [1], [0, 0, 1, 1], [], []>} : vector<8x128xf32>, vector<128x128xf32>, vector<8x128xf32> -> vector<8x128xf32>
    %103 = arith.addf %99, %102 : vector<8x128xf32>
    %104 = arith.addf %103, %6 : vector<8x128xf32>
    %105 = math.tanh %104 : vector<8x128xf32>
    %c1_111 = arith.constant 1 : index
    %c0_112 = arith.constant 0 : index
    %c0_113 = arith.constant 0 : index
    %c0_114 = arith.constant 0 : index
    %106 = vector.load %arg7[%c1_111, %c0_112, %c0_113, %c0_114] : memref<2x2x128x128xf32, #tpu.memory_space<vmem>>, vector<1x1x128x128xf32>
    %107 = vector.shape_cast %106 : vector<1x1x128x128xf32> to vector<128x128xf32>
    %cst_115 = arith.constant dense<0.000000e+00> : vector<8x128xf32>
    %108 = tpu.matmul %82, %107, %cst_115 {dimension_numbers = #tpu.dot_dimension_numbers<[1], [0], [0], [1], [0, 0, 1, 1], [], []>} : vector<8x128xf32>, vector<128x128xf32>, vector<8x128xf32> -> vector<8x128xf32>
    %c1_116 = arith.constant 1 : index
    %c1_117 = arith.constant 1 : index
    %c0_118 = arith.constant 0 : index
    %c0_119 = arith.constant 0 : index
    %109 = vector.load %arg7[%c1_116, %c1_117, %c0_118, %c0_119] : memref<2x2x128x128xf32, #tpu.memory_space<vmem>>, vector<1x1x128x128xf32>
    %110 = vector.shape_cast %109 : vector<1x1x128x128xf32> to vector<128x128xf32>
    %cst_120 = arith.constant dense<0.000000e+00> : vector<8x128xf32>
    %111 = tpu.matmul %91, %110, %cst_120 {dimension_numbers = #tpu.dot_dimension_numbers<[1], [0], [0], [1], [0, 0, 1, 1], [], []>} : vector<8x128xf32>, vector<128x128xf32>, vector<8x128xf32> -> vector<8x128xf32>
    %112 = arith.addf %108, %111 : vector<8x128xf32>
    %113 = arith.addf %112, %10 : vector<8x128xf32>
    %114 = math.tanh %113 : vector<8x128xf32>
    %c3_121 = arith.constant 3 : index
    %c0_122 = arith.constant 0 : index
    %c0_123 = arith.constant 0 : index
    %115 = vector.load %arg5[%c3_121, %c0_122, %c0_123] : memref<8x8x128xf32, #tpu.memory_space<vmem>>, vector<1x8x128xf32>
    %116 = vector.shape_cast %115 : vector<1x8x128xf32> to vector<8x128xf32>
    %117 = vector.shape_cast %114 : vector<8x128xf32> to vector<1x8x128xf32>
    tpu.vector_store %arg5[%c3_121, %c0_122, %c0_123], %117 {strides = array<i32>} : memref<8x8x128xf32, #tpu.memory_space<vmem>>, vector<1x8x128xf32>,
    %c5 = arith.constant 5 : index
    %c0_124 = arith.constant 0 : index
    %c0_125 = arith.constant 0 : index
    %118 = vector.load %arg2[%c5, %c0_124, %c0_125] : memref<8x8x128xf32, #tpu.memory_space<vmem>>, vector<1x8x128xf32>
    %119 = vector.shape_cast %118 : vector<1x8x128xf32> to vector<8x128xf32>
    %c0_126 = arith.constant 0 : index
    %c0_127 = arith.constant 0 : index
    %c0_128 = arith.constant 0 : index
    %c0_129 = arith.constant 0 : index
    %120 = vector.load %arg7[%c0_126, %c0_127, %c0_128, %c0_129] : memref<2x2x128x128xf32, #tpu.memory_space<vmem>>, vector<1x1x128x128xf32>
    %121 = vector.shape_cast %120 : vector<1x1x128x128xf32> to vector<128x128xf32>
    %cst_130 = arith.constant dense<0.000000e+00> : vector<8x128xf32>
    %122 = tpu.matmul %119, %121, %cst_130 {dimension_numbers = #tpu.dot_dimension_numbers<[1], [0], [0], [1], [0, 0, 1, 1], [], []>} : vector<8x128xf32>, vector<128x128xf32>, vector<8x128xf32> -> vector<8x128xf32>
    %c0_131 = arith.constant 0 : index
    %c1_132 = arith.constant 1 : index
    %c0_133 = arith.constant 0 : index
    %c0_134 = arith.constant 0 : index
    %123 = vector.load %arg7[%c0_131, %c1_132, %c0_133, %c0_134] : memref<2x2x128x128xf32, #tpu.memory_space<vmem>>, vector<1x1x128x128xf32>
    %124 = vector.shape_cast %123 : vector<1x1x128x128xf32> to vector<128x128xf32>
    %cst_135 = arith.constant dense<0.000000e+00> : vector<8x128xf32>
    %125 = tpu.matmul %105, %124, %cst_135 {dimension_numbers = #tpu.dot_dimension_numbers<[1], [0], [0], [1], [0, 0, 1, 1], [], []>} : vector<8x128xf32>, vector<128x128xf32>, vector<8x128xf32> -> vector<8x128xf32>
    %126 = arith.addf %122, %125 : vector<8x128xf32>
    %127 = arith.addf %126, %6 : vector<8x128xf32>
    %128 = math.tanh %127 : vector<8x128xf32>
    %c1_136 = arith.constant 1 : index
    %c0_137 = arith.constant 0 : index
    %c0_138 = arith.constant 0 : index
    %c0_139 = arith.constant 0 : index
    %129 = vector.load %arg7[%c1_136, %c0_137, %c0_138, %c0_139] : memref<2x2x128x128xf32, #tpu.memory_space<vmem>>, vector<1x1x128x128xf32>
    %130 = vector.shape_cast %129 : vector<1x1x128x128xf32> to vector<128x128xf32>
    %cst_140 = arith.constant dense<0.000000e+00> : vector<8x128xf32>
    %131 = tpu.matmul %105, %130, %cst_140 {dimension_numbers = #tpu.dot_dimension_numbers<[1], [0], [0], [1], [0, 0, 1, 1], [], []>} : vector<8x128xf32>, vector<128x128xf32>, vector<8x128xf32> -> vector<8x128xf32>
    %c1_141 = arith.constant 1 : index
    %c1_142 = arith.constant 1 : index
    %c0_143 = arith.constant 0 : index
    %c0_144 = arith.constant 0 : index
    %132 = vector.load %arg7[%c1_141, %c1_142, %c0_143, %c0_144] : memref<2x2x128x128xf32, #tpu.memory_space<vmem>>, vector<1x1x128x128xf32>
    %133 = vector.shape_cast %132 : vector<1x1x128x128xf32> to vector<128x128xf32>
    %cst_145 = arith.constant dense<0.000000e+00> : vector<8x128xf32>
    %134 = tpu.matmul %114, %133, %cst_145 {dimension_numbers = #tpu.dot_dimension_numbers<[1], [0], [0], [1], [0, 0, 1, 1], [], []>} : vector<8x128xf32>, vector<128x128xf32>, vector<8x128xf32> -> vector<8x128xf32>
    %135 = arith.addf %131, %134 : vector<8x128xf32>
    %136 = arith.addf %135, %10 : vector<8x128xf32>
    %137 = math.tanh %136 : vector<8x128xf32>
    %c4_146 = arith.constant 4 : index
    %c0_147 = arith.constant 0 : index
    %c0_148 = arith.constant 0 : index
    %138 = vector.load %arg5[%c4_146, %c0_147, %c0_148] : memref<8x8x128xf32, #tpu.memory_space<vmem>>, vector<1x8x128xf32>
    %139 = vector.shape_cast %138 : vector<1x8x128xf32> to vector<8x128xf32>
    %140 = vector.shape_cast %137 : vector<8x128xf32> to vector<1x8x128xf32>
    tpu.vector_store %arg5[%c4_146, %c0_147, %c0_148], %140 {strides = array<i32>} : memref<8x8x128xf32, #tpu.memory_space<vmem>>, vector<1x8x128xf32>,
    %c6 = arith.constant 6 : index
    %c0_149 = arith.constant 0 : index
    %c0_150 = arith.constant 0 : index
    %141 = vector.load %arg2[%c6, %c0_149, %c0_150] : memref<8x8x128xf32, #tpu.memory_space<vmem>>, vector<1x8x128xf32>
    %142 = vector.shape_cast %141 : vector<1x8x128xf32> to vector<8x128xf32>
    %c0_151 = arith.constant 0 : index
    %c0_152 = arith.constant 0 : index
    %c0_153 = arith.constant 0 : index
    %c0_154 = arith.constant 0 : index
    %143 = vector.load %arg7[%c0_151, %c0_152, %c0_153, %c0_154] : memref<2x2x128x128xf32, #tpu.memory_space<vmem>>, vector<1x1x128x128xf32>
    %144 = vector.shape_cast %143 : vector<1x1x128x128xf32> to vector<128x128xf32>
    %cst_155 = arith.constant dense<0.000000e+00> : vector<8x128xf32>
    %145 = tpu.matmul %142, %144, %cst_155 {dimension_numbers = #tpu.dot_dimension_numbers<[1], [0], [0], [1], [0, 0, 1, 1], [], []>} : vector<8x128xf32>, vector<128x128xf32>, vector<8x128xf32> -> vector<8x128xf32>
    %c0_156 = arith.constant 0 : index
    %c1_157 = arith.constant 1 : index
    %c0_158 = arith.constant 0 : index
    %c0_159 = arith.constant 0 : index
    %146 = vector.load %arg7[%c0_156, %c1_157, %c0_158, %c0_159] : memref<2x2x128x128xf32, #tpu.memory_space<vmem>>, vector<1x1x128x128xf32>
    %147 = vector.shape_cast %146 : vector<1x1x128x128xf32> to vector<128x128xf32>
    %cst_160 = arith.constant dense<0.000000e+00> : vector<8x128xf32>
    %148 = tpu.matmul %128, %147, %cst_160 {dimension_numbers = #tpu.dot_dimension_numbers<[1], [0], [0], [1], [0, 0, 1, 1], [], []>} : vector<8x128xf32>, vector<128x128xf32>, vector<8x128xf32> -> vector<8x128xf32>
    %149 = arith.addf %145, %148 : vector<8x128xf32>
    %150 = arith.addf %149, %6 : vector<8x128xf32>
    %151 = math.tanh %150 : vector<8x128xf32>
    %c1_161 = arith.constant 1 : index
    %c0_162 = arith.constant 0 : index
    %c0_163 = arith.constant 0 : index
    %c0_164 = arith.constant 0 : index
    %152 = vector.load %arg7[%c1_161, %c0_162, %c0_163, %c0_164] : memref<2x2x128x128xf32, #tpu.memory_space<vmem>>, vector<1x1x128x128xf32>
    %153 = vector.shape_cast %152 : vector<1x1x128x128xf32> to vector<128x128xf32>
    %cst_165 = arith.constant dense<0.000000e+00> : vector<8x128xf32>
    %154 = tpu.matmul %128, %153, %cst_165 {dimension_numbers = #tpu.dot_dimension_numbers<[1], [0], [0], [1], [0, 0, 1, 1], [], []>} : vector<8x128xf32>, vector<128x128xf32>, vector<8x128xf32> -> vector<8x128xf32>
    %c1_166 = arith.constant 1 : index
    %c1_167 = arith.constant 1 : index
    %c0_168 = arith.constant 0 : index
    %c0_169 = arith.constant 0 : index
    %155 = vector.load %arg7[%c1_166, %c1_167, %c0_168, %c0_169] : memref<2x2x128x128xf32, #tpu.memory_space<vmem>>, vector<1x1x128x128xf32>
    %156 = vector.shape_cast %155 : vector<1x1x128x128xf32> to vector<128x128xf32>
    %cst_170 = arith.constant dense<0.000000e+00> : vector<8x128xf32>
    %157 = tpu.matmul %137, %156, %cst_170 {dimension_numbers = #tpu.dot_dimension_numbers<[1], [0], [0], [1], [0, 0, 1, 1], [], []>} : vector<8x128xf32>, vector<128x128xf32>, vector<8x128xf32> -> vector<8x128xf32>
    %158 = arith.addf %154, %157 : vector<8x128xf32>
    %159 = arith.addf %158, %10 : vector<8x128xf32>
    %160 = math.tanh %159 : vector<8x128xf32>
    %c5_171 = arith.constant 5 : index
    %c0_172 = arith.constant 0 : index
    %c0_173 = arith.constant 0 : index
    %161 = vector.load %arg5[%c5_171, %c0_172, %c0_173] : memref<8x8x128xf32, #tpu.memory_space<vmem>>, vector<1x8x128xf32>
    %162 = vector.shape_cast %161 : vector<1x8x128xf32> to vector<8x128xf32>
    %163 = vector.shape_cast %160 : vector<8x128xf32> to vector<1x8x128xf32>
    tpu.vector_store %arg5[%c5_171, %c0_172, %c0_173], %163 {strides = array<i32>} : memref<8x8x128xf32, #tpu.memory_space<vmem>>, vector<1x8x128xf32>,
    %c7 = arith.constant 7 : index
    %c0_174 = arith.constant 0 : index
    %c0_175 = arith.constant 0 : index
    %164 = vector.load %arg2[%c7, %c0_174, %c0_175] : memref<8x8x128xf32, #tpu.memory_space<vmem>>, vector<1x8x128xf32>
    %165 = vector.shape_cast %164 : vector<1x8x128xf32> to vector<8x128xf32>
    %c0_176 = arith.constant 0 : index
    %c0_177 = arith.constant 0 : index
    %c0_178 = arith.constant 0 : index
    %c0_179 = arith.constant 0 : index
    %166 = vector.load %arg7[%c0_176, %c0_177, %c0_178, %c0_179] : memref<2x2x128x128xf32, #tpu.memory_space<vmem>>, vector<1x1x128x128xf32>
    %167 = vector.shape_cast %166 : vector<1x1x128x128xf32> to vector<128x128xf32>
    %cst_180 = arith.constant dense<0.000000e+00> : vector<8x128xf32>
    %168 = tpu.matmul %165, %167, %cst_180 {dimension_numbers = #tpu.dot_dimension_numbers<[1], [0], [0], [1], [0, 0, 1, 1], [], []>} : vector<8x128xf32>, vector<128x128xf32>, vector<8x128xf32> -> vector<8x128xf32>
    %c0_181 = arith.constant 0 : index
    %c1_182 = arith.constant 1 : index
    %c0_183 = arith.constant 0 : index
    %c0_184 = arith.constant 0 : index
    %169 = vector.load %arg7[%c0_181, %c1_182, %c0_183, %c0_184] : memref<2x2x128x128xf32, #tpu.memory_space<vmem>>, vector<1x1x128x128xf32>
    %170 = vector.shape_cast %169 : vector<1x1x128x128xf32> to vector<128x128xf32>
    %cst_185 = arith.constant dense<0.000000e+00> : vector<8x128xf32>
    %171 = tpu.matmul %151, %170, %cst_185 {dimension_numbers = #tpu.dot_dimension_numbers<[1], [0], [0], [1], [0, 0, 1, 1], [], []>} : vector<8x128xf32>, vector<128x128xf32>, vector<8x128xf32> -> vector<8x128xf32>
    %172 = arith.addf %168, %171 : vector<8x128xf32>
    %173 = arith.addf %172, %6 : vector<8x128xf32>
    %174 = math.tanh %173 : vector<8x128xf32>
    %c1_186 = arith.constant 1 : index
    %c0_187 = arith.constant 0 : index
    %c0_188 = arith.constant 0 : index
    %c0_189 = arith.constant 0 : index
    %175 = vector.load %arg7[%c1_186, %c0_187, %c0_188, %c0_189] : memref<2x2x128x128xf32, #tpu.memory_space<vmem>>, vector<1x1x128x128xf32>
    %176 = vector.shape_cast %175 : vector<1x1x128x128xf32> to vector<128x128xf32>
    %cst_190 = arith.constant dense<0.000000e+00> : vector<8x128xf32>
    %177 = tpu.matmul %151, %176, %cst_190 {dimension_numbers = #tpu.dot_dimension_numbers<[1], [0], [0], [1], [0, 0, 1, 1], [], []>} : vector<8x128xf32>, vector<128x128xf32>, vector<8x128xf32> -> vector<8x128xf32>
    %c1_191 = arith.constant 1 : index
    %c1_192 = arith.constant 1 : index
    %c0_193 = arith.constant 0 : index
    %c0_194 = arith.constant 0 : index
    %178 = vector.load %arg7[%c1_191, %c1_192, %c0_193, %c0_194] : memref<2x2x128x128xf32, #tpu.memory_space<vmem>>, vector<1x1x128x128xf32>
    %179 = vector.shape_cast %178 : vector<1x1x128x128xf32> to vector<128x128xf32>
    %cst_195 = arith.constant dense<0.000000e+00> : vector<8x128xf32>
    %180 = tpu.matmul %160, %179, %cst_195 {dimension_numbers = #tpu.dot_dimension_numbers<[1], [0], [0], [1], [0, 0, 1, 1], [], []>} : vector<8x128xf32>, vector<128x128xf32>, vector<8x128xf32> -> vector<8x128xf32>
    %181 = arith.addf %177, %180 : vector<8x128xf32>
    %182 = arith.addf %181, %10 : vector<8x128xf32>
    %183 = math.tanh %182 : vector<8x128xf32>
    %c6_196 = arith.constant 6 : index
    %c0_197 = arith.constant 0 : index
    %c0_198 = arith.constant 0 : index
    %184 = vector.load %arg5[%c6_196, %c0_197, %c0_198] : memref<8x8x128xf32, #tpu.memory_space<vmem>>, vector<1x8x128xf32>
    %185 = vector.shape_cast %184 : vector<1x8x128xf32> to vector<8x128xf32>
    %186 = vector.shape_cast %183 : vector<8x128xf32> to vector<1x8x128xf32>
    tpu.vector_store %arg5[%c6_196, %c0_197, %c0_198], %186 {strides = array<i32>} : memref<8x8x128xf32, #tpu.memory_space<vmem>>, vector<1x8x128xf32>,
    %c1_199 = arith.constant 1 : index
    %c0_200 = arith.constant 0 : index
    %c0_201 = arith.constant 0 : index
    %c0_202 = arith.constant 0 : index
    %187 = vector.load %arg7[%c1_199, %c0_200, %c0_201, %c0_202] : memref<2x2x128x128xf32, #tpu.memory_space<vmem>>, vector<1x1x128x128xf32>
    %188 = vector.shape_cast %187 : vector<1x1x128x128xf32> to vector<128x128xf32>
    %cst_203 = arith.constant dense<0.000000e+00> : vector<8x128xf32>
    %189 = tpu.matmul %174, %188, %cst_203 {dimension_numbers = #tpu.dot_dimension_numbers<[1], [0], [0], [1], [0, 0, 1, 1], [], []>} : vector<8x128xf32>, vector<128x128xf32>, vector<8x128xf32> -> vector<8x128xf32>
    %c1_204 = arith.constant 1 : index
    %c1_205 = arith.constant 1 : index
    %c0_206 = arith.constant 0 : index
    %c0_207 = arith.constant 0 : index
    %190 = vector.load %arg7[%c1_204, %c1_205, %c0_206, %c0_207] : memref<2x2x128x128xf32, #tpu.memory_space<vmem>>, vector<1x1x128x128xf32>
    %191 = vector.shape_cast %190 : vector<1x1x128x128xf32> to vector<128x128xf32>
    %cst_208 = arith.constant dense<0.000000e+00> : vector<8x128xf32>
    %192 = tpu.matmul %183, %191, %cst_208 {dimension_numbers = #tpu.dot_dimension_numbers<[1], [0], [0], [1], [0, 0, 1, 1], [], []>} : vector<8x128xf32>, vector<128x128xf32>, vector<8x128xf32> -> vector<8x128xf32>
    %193 = arith.addf %189, %192 : vector<8x128xf32>
    %194 = arith.addf %193, %10 : vector<8x128xf32>
    %195 = math.tanh %194 : vector<8x128xf32>
    %c7_209 = arith.constant 7 : index
    %c0_210 = arith.constant 0 : index
    %c0_211 = arith.constant 0 : index
    %196 = vector.load %arg5[%c7_209, %c0_210, %c0_211] : memref<8x8x128xf32, #tpu.memory_space<vmem>>, vector<1x8x128xf32>
    %197 = vector.shape_cast %196 : vector<1x8x128xf32> to vector<8x128xf32>
    %198 = vector.shape_cast %195 : vector<8x128xf32> to vector<1x8x128xf32>
    tpu.vector_store %arg5[%c7_209, %c0_210, %c0_211], %198 {strides = array<i32>} : memref<8x8x128xf32, #tpu.memory_space<vmem>>, vector<1x8x128xf32>,
    %c0_212 = arith.constant 0 : index
    %c0_213 = arith.constant 0 : index
    %c0_214 = arith.constant 0 : index
    %199 = vector.load %arg6[%c0_212, %c0_213, %c0_214] : memref<2x8x128xf32, #tpu.memory_space<vmem>>, vector<1x8x128xf32>
    %200 = vector.shape_cast %199 : vector<1x8x128xf32> to vector<8x128xf32>
    %201 = vector.shape_cast %174 : vector<8x128xf32> to vector<1x8x128xf32>
    tpu.vector_store %arg6[%c0_212, %c0_213, %c0_214], %201 {strides = array<i32>} : memref<2x8x128xf32, #tpu.memory_space<vmem>>, vector<1x8x128xf32>,
    %c1_215 = arith.constant 1 : index
    %c0_216 = arith.constant 0 : index
    %c0_217 = arith.constant 0 : index
    %202 = vector.load %arg6[%c1_215, %c0_216, %c0_217] : memref<2x8x128xf32, #tpu.memory_space<vmem>>, vector<1x8x128xf32>
    %203 = vector.shape_cast %202 : vector<1x8x128xf32> to vector<8x128xf32>
    %204 = vector.shape_cast %195 : vector<8x128xf32> to vector<1x8x128xf32>
    tpu.vector_store %arg6[%c1_215, %c0_216, %c0_217], %204 {strides = array<i32>} : memref<2x8x128xf32, #tpu.memory_space<vmem>>, vector<1x8x128xf32>,
    return
  }
  func.func @transform_0(%arg0: i32, %arg1: i32) -> (i32, i32, i32) {
    %c0_i32 = arith.constant 0 : i32
    %c0_i32_0 = arith.constant 0 : i32
    return %arg1, %arg0, %c0_i32 : i32, i32, i32
  }
  func.func @transform_1(%arg0: i32, %arg1: i32) -> (i32, i32, i32) {
    %c0_i32 = arith.constant 0 : i32
    %c0_i32_0 = arith.constant 0 : i32
    %c0_i32_1 = arith.constant 0 : i32
    %c0_i32_2 = arith.constant 0 : i32
    return %c0_i32, %c0_i32_0, %c0_i32_1 : i32, i32, i32
  }
  func.func @transform_3(%arg0: i32, %arg1: i32) -> (i32, i32, i32) {
    %c0_i32 = arith.constant 0 : i32
    %c0_i32_0 = arith.constant 0 : i32
    return %arg1, %arg0, %c0_i32 : i32, i32, i32
  }
  func.func @transform_4(%arg0: i32, %arg1: i32) -> (i32, i32, i32) {
    %c0_i32 = arith.constant 0 : i32
    %c0_i32_0 = arith.constant 0 : i32
    %c0_i32_1 = arith.constant 0 : i32
    return %c0_i32, %arg0, %c0_i32_0 : i32, i32, i32
  }
}

</mosaic_0001>

<bundles_post_ra>
// kernel: tpu_custom_call.1
= control target key start
LH: loop header
LB: loop body
LE: loop exit
PB: predicated region body
PF: predicated region fallthrough
CT: control target
= control target key end

     0   :  { %10 = vsyncpa [#allocation5], 0  ;;  %s2338_s0 = inlined_call_operand.hbm [shape: f32[8,8,128], index: 0, kind: input, shape index: {}]   ;;  %s2339_s1 = inlined_call_operand.hbm [shape: f32[2,1,128], index: 1, kind: input, shape index: {}]   ;;  %s2340_s2 = inlined_call_operand.hbm [shape: f32[2,2,128,128], index: 2, kind: input, shape index: {}]   ;;  %s2341_s3 = inlined_call_operand.hbm [shape: f32[8,8,128], index: 3, kind: output, shape index: {0}]   ;;  %s2342_s4 = inlined_call_operand.hbm [shape: f32[2,8,128], index: 4, kind: output, shape index: {1}]  }
   0x1   :  { %11 = vsyncpa [#allocation8], 0 }
   0x2   :  { %12 = vsyncpa [#allocation6], 0 }
   0x3   :  { %13 = vsyncpa [#allocation11], 0  ;;  %s18_s17 = sshll.u32 %s2338_s0, 4  ;;  %s1491_s18 = smov [#allocation4]   ;;  %s19_s17 = int_to_ptr.hbm [resolvable:$true] %s18_s17 }
   0x4   :  { %s20_s19 = sshll.u32 %s1491_s18, 4  ;;  %s31_s22 = sshll.u32 %s2339_s1, 4  ;;  %s21_s19 = int_to_ptr.vmem [resolvable:$true] %s20_s19  ;;  %s32_s22 = int_to_ptr.hbm [resolvable:$true] %s31_s22 }
   0x5   :  { %s1492_s23 = smov 128   ;;  %s1493_s24 = smov 8  }
   0x6   :  { %26 = dma.hbm_to_vmem [thread:$0]  %s19_s17, 1024, %s21_s19, [#allocation5], %s1492_s23, %s1492_s23, %s1493_s24  }
   0x7   :  { %s1494_s25 = smov [#allocation7]   ;;  %s1495_s27 = smov 16  }
   0x8   :  { %s33_s26 = sshll.u32 %s1494_s25, 4  ;;  %s1496_s0 = smov 1   ;;  %s34_s26 = int_to_ptr.vmem [resolvable:$true] %s33_s26 }
   0x9   :  { %39 = dma.hbm_to_vmem [thread:$0]  %s32_s22, 32, %s34_s26, [#allocation8], %s1495_s27, %s1495_s27, %s1496_s0  }
   0xa   :  { %1481 = dma.done.wait [#allocation5], 1024  }
   0xb   :  { %1482 = vsyncadd [#allocation5], 4294966272 }
   0xc   :  { %1483 = dma.done.wait [#allocation8], 32  }
   0xd   :  { %1484 = vsyncadd [#allocation8], 4294967264  ;;  %s59_s1 = sshll.u32 %s2340_s2, 4  ;;  %s1497_s30 = smov [#allocation2]   ;;  %s60_s1 = int_to_ptr.hbm [resolvable:$true] %s59_s1 }
   0xe   :  { %s61_s5 = sshll.u32 %s1497_s30, 4  ;;  %s62_s5 = int_to_ptr.vmem [resolvable:$true] %s61_s5 }
   0xf   :  { %64 = dma.hbm_to_vmem [thread:$0]  %s60_s1, 8192, %s62_s5, [#allocation3] }
  0x10   :  { %1485 = dma.done.wait [#allocation3], 8192 }
  0x11   :  { %1486 = vsyncadd [#allocation3], 4294959104  ;;  %v1538_v0 = vld [vmem:[#allocation2 + $0xf8] sm:$0xff]  ;;  %v1542_v2 = vld [vmem:[#allocation2 + $0xf0] sm:$0xff]  ;;  %v2343_v35 = vmov 0.0   ;;  %s1499_s2 = smov [#allocation9]  }
  0x12   :  { %v1540_v1 = vld [vmem:[#allocation2 + $0x78] sm:$0xff]  ;;  %118 = vmatpush.msra.mxu0 %v1538_v0  ;;  %v1546_v3 = vld [vmem:[#allocation2 + $0x70] sm:$0xff]  ;;  %v1548_v4 = vld [vmem:[#allocation2 + $0xe8] sm:$0xff]  ;;  %162 = vmatpush.msra.mxu2 %v1538_v0  ;;  %s1275_s6 = sshll.u32 %s1499_s2, 4  ;;  %s1277_s9 = sshll.u32 %s2341_s3, 4  ;;  %s1276_s6 = int_to_ptr.vmem [resolvable:$true] %s1275_s6  ;;  %s1278_s9 = int_to_ptr.hbm [resolvable:$true] %s1277_s9 }
  0x13   :  { %138 = vmatpush.msra.mxu1 %v1540_v1  ;;  %v1550_v5 = vld [vmem:[#allocation2 + $0x68] sm:$0xff]  ;;  %182 = vmatpush.msra.mxu3 %v1540_v1  ;;  %v1556_v6 = vld [vmem:[#allocation2 + $0xe0] sm:$0xff]  ;;  %v1564_v8 = vld [vmem:[#allocation2 + $0xd8] sm:$0xff]  ;;  %s1500_s10 = smov [#allocation10]   ;;  %s1290_s14 = sshll.u32 %s2342_s4, 4  ;;  %s1291_s14 = int_to_ptr.hbm [resolvable:$true] %s1290_s14 }
  0x14   :  { %119 = vmatpush.msra.mxu0 %v1542_v2  ;;  %v1558_v7 = vld [vmem:[#allocation2 + $0x60] sm:$0xff]  ;;  %163 = vmatpush.msra.mxu2 %v1542_v2  ;;  %v1566_v9 = vld [vmem:[#allocation2 + $0x58] sm:$0xff]  ;;  %v1572_v10 = vld [vmem:[#allocation2 + $0xd0] sm:$0xff]  ;;  %s1288_s11 = sshll.u32 %s1500_s10, 4  ;;  %s1289_s11 = int_to_ptr.vmem [resolvable:$true] %s1288_s11 }
  0x15   :  { %139 = vmatpush.msra.mxu1 %v1546_v3  ;;  %183 = vmatpush.msra.mxu3 %v1546_v3  ;;  %v1574_v11 = vld [vmem:[#allocation2 + $0x50] sm:$0xff]  ;;  %v1580_v12 = vld [vmem:[#allocation2 + $0xc8] sm:$0xff]  ;;  %v1588_v14 = vld [vmem:[#allocation2 + $0xc0] sm:$0xff] }
  0x16   :  { %120 = vmatpush.msra.mxu0 %v1548_v4  ;;  %164 = vmatpush.msra.mxu2 %v1548_v4  ;;  %2361 = vst [vmem:[#allocation21_spill] sm:$0xff] %v1574_v11  ;;  %v1582_v13 = vld [vmem:[#allocation2 + $0x48] sm:$0xff]  ;;  %v1590_v15 = vld [vmem:[#allocation2 + $0x40] sm:$0xff]  ;;  %v1596_v16 = vld [vmem:[#allocation2 + $0xb8] sm:$0xff] }
  0x17   :  { %140 = vmatpush.msra.mxu1 %v1550_v5  ;;  %184 = vmatpush.msra.mxu3 %v1550_v5  ;;  %2362 = vst [vmem:[#allocation22_spill] sm:$0xff] %v1582_v13  ;;  %v1598_v17 = vld [vmem:[#allocation2 + $0x38] sm:$0xff]  ;;  %v1604_v18 = vld [vmem:[#allocation2 + $0xb0] sm:$0xff]  ;;  %v1612_v20 = vld [vmem:[#allocation2 + $0xa8] sm:$0xff] }
  0x18   :  { %121 = vmatpush.msra.mxu0 %v1556_v6  ;;  %165 = vmatpush.msra.mxu2 %v1556_v6  ;;  %2363 = vst [vmem:[#allocation23_spill] sm:$0xff] %v1590_v15  ;;  %v1606_v19 = vld [vmem:[#allocation2 + $0x30] sm:$0xff]  ;;  %v1614_v21 = vld [vmem:[#allocation2 + $0x28] sm:$0xff]  ;;  %v1620_v22 = vld [vmem:[#allocation2 + $0xa0] sm:$0xff] }
  0x19   :  { %141 = vmatpush.msra.mxu1 %v1558_v7  ;;  %185 = vmatpush.msra.mxu3 %v1558_v7  ;;  %v1622_v23 = vld [vmem:[#allocation2 + $0x20] sm:$0xff]  ;;  %v1628_v24 = vld [vmem:[#allocation2 + $0x98] sm:$0xff]  ;;  %v1636_v26 = vld [vmem:[#allocation2 + $0x90] sm:$0xff] }
  0x1a   :  { %122 = vmatpush.msra.mxu0 %v1564_v8  ;;  %166 = vmatpush.msra.mxu2 %v1564_v8  ;;  %v1630_v25 = vld [vmem:[#allocation2 + $0x18] sm:$0xff]  ;;  %v1638_v27 = vld [vmem:[#allocation2 + $0x10] sm:$0xff]  ;;  %v1644_v28 = vld [vmem:[#allocation2 + $0x88] sm:$0xff] }
  0x1b   :  { %142 = vmatpush.msra.mxu1 %v1566_v9  ;;  %186 = vmatpush.msra.mxu3 %v1566_v9  ;;  %2364 = vst [vmem:[#allocation24_spill] sm:$0xff] %v1644_v28  ;;  %v1646_v29 = vld [vmem:[#allocation2 + $0x8] sm:$0xff]  ;;  %v1652_v30 = vld [vmem:[#allocation2 + $0x80] sm:$0xff]  ;;  %v1660_v33 = vld [vmem:[#allocation2 + $0x1f8] sm:$0xff] }
  0x1c   :  { %123 = vmatpush.msra.mxu0 %v1572_v10  ;;  %167 = vmatpush.msra.mxu2 %v1572_v10  ;;  %2365 = vst [vmem:[#allocation25_spill] sm:$0xff] %v1652_v30  ;;  %v1654_v31 = vld [vmem:[#allocation2] sm:$0xff]  ;;  %v1662_v34 = vld [vmem:[#allocation2 + $0x178] sm:$0xff]  ;;  %v1669_v36 = vld [vmem:[#allocation2 + $0x1f0] sm:$0xff] }
  0x1d   :  { %143 = vmatpush.msra.mxu1 %v1574_v11  ;;  %187 = vmatpush.msra.mxu3 %v1574_v11  ;;  %v84_v32 = vld [vmem:[#allocation4] sm:$0xff]  ;;  %v1671_v37 = vld [vmem:[#allocation2 + $0x170] sm:$0xff]  ;;  %v1675_v38 = vld [vmem:[#allocation2 + $0x1e8] sm:$0xff] }
  0x1e   :  { %124 = vmatpush.msra.mxu0 %v1580_v12  ;;  %168 = vmatpush.msra.mxu2 %v1580_v12  ;;  %v1677_v39 = vld [vmem:[#allocation2 + $0x168] sm:$0xff]  ;;  %v1683_v40 = vld [vmem:[#allocation2 + $0x1e0] sm:$0xff]  ;;  %v1691_v42 = vld [vmem:[#allocation2 + $0x1d8] sm:$0xff] }
  0x1f   :  { %144 = vmatpush.msra.mxu1 %v1582_v13  ;;  %188 = vmatpush.msra.mxu3 %v1582_v13  ;;  %v1685_v41 = vld [vmem:[#allocation2 + $0x160] sm:$0xff]  ;;  %v1693_v43 = vld [vmem:[#allocation2 + $0x158] sm:$0xff]  ;;  %v1699_v44 = vld [vmem:[#allocation2 + $0x1d0] sm:$0xff] }
  0x20   :  { %125 = vmatpush.msra.mxu0 %v1588_v14  ;;  %169 = vmatpush.msra.mxu2 %v1588_v14  ;;  %v1701_v45 = vld [vmem:[#allocation2 + $0x150] sm:$0xff]  ;;  %v1707_v46 = vld [vmem:[#allocation2 + $0x1c8] sm:$0xff]  ;;  %v1715_v48 = vld [vmem:[#allocation2 + $0x1c0] sm:$0xff] }
  0x21   :  { %145 = vmatpush.msra.mxu1 %v1590_v15  ;;  %189 = vmatpush.msra.mxu3 %v1590_v15  ;;  %v1709_v47 = vld [vmem:[#allocation2 + $0x148] sm:$0xff]  ;;  %v1717_v49 = vld [vmem:[#allocation2 + $0x140] sm:$0xff]  ;;  %v1723_v50 = vld [vmem:[#allocation2 + $0x1b8] sm:$0xff] }
  0x22   :  { %126 = vmatpush.msra.mxu0 %v1596_v16  ;;  %170 = vmatpush.msra.mxu2 %v1596_v16  ;;  %v1725_v51 = vld [vmem:[#allocation2 + $0x138] sm:$0xff]  ;;  %v1731_v52 = vld [vmem:[#allocation2 + $0x1b0] sm:$0xff]  ;;  %v1759_v54 = vld [vmem:[#allocation2 + $0x1a8] sm:$0xff] }
  0x23   :  { %146 = vmatpush.msra.mxu1 %v1598_v17  ;;  %190 = vmatpush.msra.mxu3 %v1598_v17  ;;  %v1733_v53 = vld [vmem:[#allocation2 + $0x130] sm:$0xff]  ;;  %v1761_v55 = vld [vmem:[#allocation2 + $0x128] sm:$0xff]  ;;  %v1765_v56 = vld [vmem:[#allocation2 + $0x1a0] sm:$0xff] }
  0x24   :  { %127 = vmatpush.msra.mxu0 %v1604_v18  ;;  %171 = vmatpush.msra.mxu2 %v1604_v18  ;;  %v1767_v57 = vld [vmem:[#allocation2 + $0x120] sm:$0xff]  ;;  %v1771_v58 = vld [vmem:[#allocation2 + $0x198] sm:$0xff]  ;;  %v1777_v60 = vld [vmem:[#allocation2 + $0x190] sm:$0xff] }
  0x25   :  { %147 = vmatpush.msra.mxu1 %v1606_v19  ;;  %191 = vmatpush.msra.mxu3 %v1606_v19  ;;  %v1773_v59 = vld [vmem:[#allocation2 + $0x118] sm:$0xff]  ;;  %v1779_v61 = vld [vmem:[#allocation2 + $0x110] sm:$0xff]  ;;  %v1781_v62 = vld [vmem:[#allocation2 + $0x188] sm:$0xff] }
  0x26   :  { %128 = vmatpush.msra.mxu0 %v1612_v20  ;;  %172 = vmatpush.msra.mxu2 %v1612_v20  ;;  %v1783_v63 = vld [vmem:[#allocation2 + $0x108] sm:$0xff] }
  0x27   :  { %148 = vmatpush.msra.mxu1 %v1614_v21  ;;  %192 = vmatpush.msra.mxu3 %v1614_v21 }
  0x28   :  { %129 = vmatpush.msra.mxu0 %v1620_v22  ;;  %173 = vmatpush.msra.mxu2 %v1620_v22 }
  0x29   :  { %149 = vmatpush.msra.mxu1 %v1622_v23  ;;  %193 = vmatpush.msra.mxu3 %v1622_v23 }
  0x2a   :  { %130 = vmatpush.msra.mxu0 %v1628_v24  ;;  %174 = vmatpush.msra.mxu2 %v1628_v24 }
  0x2b   :  { %150 = vmatpush.msra.mxu1 %v1630_v25  ;;  %194 = vmatpush.msra.mxu3 %v1630_v25 }
  0x2c   :  { %131 = vmatpush.msra.mxu0 %v1636_v26  ;;  %175 = vmatpush.msra.mxu2 %v1636_v26 }
  0x2d   :  { %151 = vmatpush.msra.mxu1 %v1638_v27  ;;  %195 = vmatpush.msra.mxu3 %v1638_v27 }
  0x2e   :  { %132 = vmatpush.msra.mxu0 %v1644_v28  ;;  %176 = vmatpush.msra.mxu2 %v1644_v28 }
  0x2f   :  { %152 = vmatpush.msra.mxu1 %v1646_v29  ;;  %196 = vmatpush.msra.mxu3 %v1646_v29 }
  0x30   :  { %133 = vmatpush.msra.mxu0 %v1652_v30  ;;  %177 = vmatpush.msra.mxu2 %v1652_v30 }
  0x31   :  { %153 = vmatpush.msra.mxu1 %v1654_v31  ;;  %134 = vmatmul.f32.vlgmr.msra.gmra.mxu0 %v2343_v35  ;;  %v1789_v35 = vld [vmem:[#allocation2 + $0x100] sm:$0xff] }
  0x32   :  { %154 = vmatmul.f32.vlgmr.msra.gmra.mxu1 %v84_v32  ;;  %238 = vmatpush.msrb.mxu0 %v1660_v33  ;;  %v1787_v32 = vld [vmem:[#allocation2 + $0x180] sm:$0xff] }
  0x33   :  { %258 = vmatpush.msrb.mxu1 %v1662_v34  ;;  %197 = vmatpush.msra.mxu3 %v1654_v31 }
  0x34   :  { %239 = vmatpush.msrb.mxu0 %v1669_v36  ;;  %315 = vmatpush.msrb.mxu2 %v1538_v0 }
  0x35   :  { %259 = vmatpush.msrb.mxu1 %v1671_v37  ;;  %335 = vmatpush.msrb.mxu3 %v1540_v1 }
  0x36   :  { %240 = vmatpush.msrb.mxu0 %v1675_v38  ;;  %316 = vmatpush.msrb.mxu2 %v1542_v2 }
  0x37   :  { %260 = vmatpush.msrb.mxu1 %v1677_v39  ;;  %336 = vmatpush.msrb.mxu3 %v1546_v3 }
  0x38   :  { %241 = vmatpush.msrb.mxu0 %v1683_v40  ;;  %317 = vmatpush.msrb.mxu2 %v1548_v4 }
  0x39   :  { %261 = vmatpush.msrb.mxu1 %v1685_v41  ;;  %337 = vmatpush.msrb.mxu3 %v1550_v5 }
  0x3a   :  { %242 = vmatpush.msrb.mxu0 %v1691_v42  ;;  %318 = vmatpush.msrb.mxu2 %v1556_v6 }
  0x3b   :  { %262 = vmatpush.msrb.mxu1 %v1693_v43  ;;  %338 = vmatpush.msrb.mxu3 %v1558_v7 }
  0x3c   :  { %243 = vmatpush.msrb.mxu0 %v1699_v44  ;;  %319 = vmatpush.msrb.mxu2 %v1564_v8 }
  0x3d   :  { %263 = vmatpush.msrb.mxu1 %v1701_v45  ;;  %339 = vmatpush.msrb.mxu3 %v1566_v9 }
  0x3e   :  { %244 = vmatpush.msrb.mxu0 %v1707_v46  ;;  %320 = vmatpush.msrb.mxu2 %v1572_v10 }
  0x3f   :  { %264 = vmatpush.msrb.mxu1 %v1709_v47  ;;  %340 = vmatpush.msrb.mxu3 %v1574_v11 }
  0x40   :  { %245 = vmatpush.msrb.mxu0 %v1715_v48  ;;  %321 = vmatpush.msrb.mxu2 %v1580_v12 }
  0x41   :  { %265 = vmatpush.msrb.mxu1 %v1717_v49  ;;  %341 = vmatpush.msrb.mxu3 %v1582_v13 }
  0x42   :  { %246 = vmatpush.msrb.mxu0 %v1723_v50  ;;  %322 = vmatpush.msrb.mxu2 %v1588_v14 }
  0x43   :  { %266 = vmatpush.msrb.mxu1 %v1725_v51  ;;  %342 = vmatpush.msrb.mxu3 %v1590_v15 }
  0x44   :  { %247 = vmatpush.msrb.mxu0 %v1731_v52  ;;  %323 = vmatpush.msrb.mxu2 %v1596_v16 }
  0x45   :  { %267 = vmatpush.msrb.mxu1 %v1733_v53  ;;  %343 = vmatpush.msrb.mxu3 %v1598_v17 }
  0x46   :  { %324 = vmatpush.msrb.mxu2 %v1604_v18  ;;  %248 = vmatpush.msrb.mxu0 %v1759_v54 }
  0x47   :  { %344 = vmatpush.msrb.mxu3 %v1606_v19  ;;  %268 = vmatpush.msrb.mxu1 %v1761_v55 }
  0x48   :  { %325 = vmatpush.msrb.mxu2 %v1612_v20  ;;  %249 = vmatpush.msrb.mxu0 %v1765_v56 }
  0x49   :  { %345 = vmatpush.msrb.mxu3 %v1614_v21  ;;  %269 = vmatpush.msrb.mxu1 %v1767_v57 }
  0x4a   :  { %326 = vmatpush.msrb.mxu2 %v1620_v22  ;;  %250 = vmatpush.msrb.mxu0 %v1771_v58 }
  0x4b   :  { %346 = vmatpush.msrb.mxu3 %v1622_v23  ;;  %270 = vmatpush.msrb.mxu1 %v1773_v59 }
  0x4c   :  { %327 = vmatpush.msrb.mxu2 %v1628_v24  ;;  %251 = vmatpush.msrb.mxu0 %v1777_v60 }
  0x4d   :  { %347 = vmatpush.msrb.mxu3 %v1630_v25  ;;  %271 = vmatpush.msrb.mxu1 %v1779_v61 }
  0x4e   :  { %328 = vmatpush.msrb.mxu2 %v1636_v26  ;;  %252 = vmatpush.msrb.mxu0 %v1781_v62 }
  0x4f   :  { %348 = vmatpush.msrb.mxu3 %v1638_v27  ;;  %272 = vmatpush.msrb.mxu1 %v1783_v63 }
  0x50   :  { %329 = vmatpush.msrb.mxu2 %v1644_v28  ;;  %253 = vmatpush.msrb.mxu0 %v1787_v32  ;;  %v2366_v28 = vmov 0.0  }
  0x51   :  { %349 = vmatpush.msrb.mxu3 %v1646_v29  ;;  %273 = vmatpush.msrb.mxu1 %v1789_v35 }
  0x52   :  { %330 = vmatpush.msrb.mxu2 %v1652_v30  ;;  %v161_v30 = vld [vmem:[#allocation4 + $0x8] sm:$0xff]  ;;  %254 = vmatmul.f32.vlgmr.msrb.gmra.mxu0 %v2366_v28  ;;  %v1823_v28 = vld [vmem:[#allocation7] ss:$0 sm:$0xff] }
  0x53   :  { %350 = vmatpush.msrb.mxu3 %v1654_v31  ;;  %389 = vmatpush.msra.mxu0 %v1660_v33 }
  0x54   :  { %198 = vmatmul.f32.vlgmr.msra.gmra.mxu3 %v161_v30  ;;  %409 = vmatpush.msra.mxu1 %v1662_v34 }
  0x55   :  { %487 = vmatpush.msra.mxu3 %v1540_v1  ;;  %390 = vmatpush.msra.mxu0 %v1669_v36 }
  0x56   :  { %410 = vmatpush.msra.mxu1 %v1671_v37 }
  0x57   :  { %488 = vmatpush.msra.mxu3 %v1546_v3  ;;  %391 = vmatpush.msra.mxu0 %v1675_v38 }
  0x58   :  { %411 = vmatpush.msra.mxu1 %v1677_v39 }
  0x59   :  { %489 = vmatpush.msra.mxu3 %v1550_v5  ;;  %392 = vmatpush.msra.mxu0 %v1683_v40 }
  0x5a   :  { %412 = vmatpush.msra.mxu1 %v1685_v41 }
  0x5b   :  { %490 = vmatpush.msra.mxu3 %v1558_v7  ;;  %393 = vmatpush.msra.mxu0 %v1691_v42 }
  0x5c   :  { %413 = vmatpush.msra.mxu1 %v1693_v43 }
  0x5d   :  { %491 = vmatpush.msra.mxu3 %v1566_v9  ;;  %394 = vmatpush.msra.mxu0 %v1699_v44 }
  0x5e   :  { %414 = vmatpush.msra.mxu1 %v1701_v45 }
  0x5f   :  { %492 = vmatpush.msra.mxu3 %v1574_v11  ;;  %395 = vmatpush.msra.mxu0 %v1707_v46 }
  0x60   :  { %415 = vmatpush.msra.mxu1 %v1709_v47 }
  0x61   :  { %493 = vmatpush.msra.mxu3 %v1582_v13  ;;  %396 = vmatpush.msra.mxu0 %v1715_v48 }
  0x62   :  { %416 = vmatpush.msra.mxu1 %v1717_v49 }
  0x63   :  { %494 = vmatpush.msra.mxu3 %v1590_v15  ;;  %397 = vmatpush.msra.mxu0 %v1723_v50 }
  0x64   :  { %417 = vmatpush.msra.mxu1 %v1725_v51 }
  0x65   :  { %495 = vmatpush.msra.mxu3 %v1598_v17  ;;  %398 = vmatpush.msra.mxu0 %v1731_v52  ;;  %v2369_v17 = vld [vmem:[#allocation21_spill] sm:$0xff] }
  0x66   :  { %418 = vmatpush.msra.mxu1 %v1733_v53 }
  0x67   :  { %496 = vmatpush.msra.mxu3 %v1606_v19  ;;  %399 = vmatpush.msra.mxu0 %v1759_v54  ;;  %v1901_v19 = vld [vmem:[#allocation7 + $0x1] ss:$0 sm:$0xff] }
  0x68   :  { %419 = vmatpush.msra.mxu1 %v1761_v55 }
  0x69   :  { %497 = vmatpush.msra.mxu3 %v1614_v21  ;;  %400 = vmatpush.msra.mxu0 %v1765_v56 }
  0x6a   :  { %420 = vmatpush.msra.mxu1 %v1767_v57 }
  0x6b   :  { %498 = vmatpush.msra.mxu3 %v1622_v23  ;;  %401 = vmatpush.msra.mxu0 %v1771_v58  ;;  %v2371_v23 = vld [vmem:[#allocation23_spill] sm:$0xff] }
  0x6c   :  { %421 = vmatpush.msra.mxu1 %v1773_v59 }
  0x6d   :  { %499 = vmatpush.msra.mxu3 %v1630_v25  ;;  %402 = vmatpush.msra.mxu0 %v1777_v60 }
  0x6e   :  { %422 = vmatpush.msra.mxu1 %v1779_v61 }
  0x6f   :  { %500 = vmatpush.msra.mxu3 %v1638_v27  ;;  %403 = vmatpush.msra.mxu0 %v1781_v62 }
  0x70   :  { %423 = vmatpush.msra.mxu1 %v1783_v63 }
  0x71   :  { %501 = vmatpush.msra.mxu3 %v1646_v29  ;;  %404 = vmatpush.msra.mxu0 %v1787_v32 }
  0x72   :  { %424 = vmatpush.msra.mxu1 %v1789_v35 }
  0x73   :  { %541 = vmatpush.msrb.mxu0 %v1660_v33  ;;  %502 = vmatpush.msra.mxu3 %v1654_v31  ;;  %v1949_v31 = vld [vmem:[#allocation2 + $0xb8] sm:$0xff] }
  0x75   :  { %542 = vmatpush.msrb.mxu0 %v1669_v36 }
  0x77   :  { %543 = vmatpush.msrb.mxu0 %v1675_v38 }
  0x79   :  { %544 = vmatpush.msrb.mxu0 %v1683_v40 }
  0x7b   :  { %545 = vmatpush.msrb.mxu0 %v1691_v42 }
  0x7d   :  { %546 = vmatpush.msrb.mxu0 %v1699_v44 }
  0x7f   :  { %547 = vmatpush.msrb.mxu0 %v1707_v46 }
  0x81   :  { %548 = vmatpush.msrb.mxu0 %v1715_v48 }
  0x83   :  { %549 = vmatpush.msrb.mxu0 %v1723_v50 }
  0x85   :  { %550 = vmatpush.msrb.mxu0 %v1731_v52 }
  0x87   :  { %551 = vmatpush.msrb.mxu0 %v1759_v54 }
  0x89   :  { %552 = vmatpush.msrb.mxu0 %v1765_v56 }
  0x8b   :  { %553 = vmatpush.msrb.mxu0 %v1771_v58 }
  0x8d   :  { %554 = vmatpush.msrb.mxu0 %v1777_v60 }
  0x8f   :  { %555 = vmatpush.msrb.mxu0 %v1781_v62 }
  0x91   :  { %556 = vmatpush.msrb.mxu0 %v1787_v32 }
  0xae   :  { %v135_v30 = vpop.f32.mrf.mxu0 }
  0xaf   :  { %v155_v13 = vpop.f32.mrf.mxu1 }
  0xb0   :  { %v156_v11 = vadd.f32 %v155_v13, %v135_v30  ;;  %v2367_v13 = vld [vmem:[#allocation24_spill] sm:$0xff]  ;;  %v2040_v30 = vld [vmem:[#allocation2 + $0x160] sm:$0xff] }
  0xb1   :  { %2374 = vst [vmem:[#allocation21_spill] sm:$0xff] %v2040_v30 }
  0xb2   :  { %v158_v15 = vadd.f32 %v1823_v28, %v156_v11 }
  0xb4   :  { %1328 = vtanh.f32 %v158_v15  ;;  %v2368_v15 = vld [vmem:[#allocation25_spill] sm:$0xff] }
  0xba   :  { %v1329_v11 = vpop.eup %1328 }
  0xbb   :  { %178 = vmatmul.f32.vlgmr.msra.gmra.mxu2 %v1329_v11  ;;  %274 = vmatmul.f32.vlgmr.msrb.gmra.mxu1 %v1329_v11  ;;  %v2044_v11 = vld [vmem:[#allocation2 + $0x1d0] sm:$0xff] }
  0xbc   :  { %467 = vmatpush.msra.mxu2 %v1538_v0  ;;  %561 = vmatpush.msrb.mxu1 %v1662_v34 }
  0xbe   :  { %468 = vmatpush.msra.mxu2 %v1542_v2  ;;  %562 = vmatpush.msrb.mxu1 %v1671_v37 }
  0xc0   :  { %469 = vmatpush.msra.mxu2 %v1548_v4  ;;  %563 = vmatpush.msrb.mxu1 %v1677_v39 }
  0xc2   :  { %470 = vmatpush.msra.mxu2 %v1556_v6  ;;  %564 = vmatpush.msrb.mxu1 %v1685_v41 }
  0xc4   :  { %471 = vmatpush.msra.mxu2 %v1564_v8  ;;  %565 = vmatpush.msrb.mxu1 %v1693_v43 }
  0xc6   :  { %472 = vmatpush.msra.mxu2 %v1572_v10  ;;  %566 = vmatpush.msrb.mxu1 %v1701_v45 }
  0xc8   :  { %473 = vmatpush.msra.mxu2 %v1580_v12  ;;  %567 = vmatpush.msrb.mxu1 %v1709_v47 }
  0xca   :  { %474 = vmatpush.msra.mxu2 %v1588_v14  ;;  %568 = vmatpush.msrb.mxu1 %v1717_v49 }
  0xcc   :  { %475 = vmatpush.msra.mxu2 %v1596_v16  ;;  %569 = vmatpush.msrb.mxu1 %v1725_v51  ;;  %v282_v16 = vld [vmem:[#allocation4 + $0x10] sm:$0xff] }
  0xcd   :  { %351 = vmatmul.f32.vlgmr.msrb.gmra.mxu3 %v282_v16 }
  0xce   :  { %476 = vmatpush.msra.mxu2 %v1604_v18  ;;  %570 = vmatpush.msrb.mxu1 %v1733_v53 }
  0xcf   :  { %639 = vmatpush.msrb.mxu3 %v1540_v1  ;;  %v255_v18 = vpop.f32.mrf.mxu0 }
  0xd0   :  { %477 = vmatpush.msra.mxu2 %v1612_v20  ;;  %571 = vmatpush.msrb.mxu1 %v1761_v55  ;;  %v2370_v20 = vld [vmem:[#allocation22_spill] sm:$0xff] }
  0xd1   :  { %640 = vmatpush.msrb.mxu3 %v1546_v3 }
  0xd2   :  { %478 = vmatpush.msra.mxu2 %v1620_v22  ;;  %572 = vmatpush.msrb.mxu1 %v1767_v57 }
  0xd3   :  { %641 = vmatpush.msrb.mxu3 %v1550_v5 }
  0xd4   :  { %479 = vmatpush.msra.mxu2 %v1628_v24  ;;  %573 = vmatpush.msrb.mxu1 %v1773_v59 }
  0xd5   :  { %642 = vmatpush.msrb.mxu3 %v1558_v7 }
  0xd6   :  { %480 = vmatpush.msra.mxu2 %v1636_v26  ;;  %574 = vmatpush.msrb.mxu1 %v1779_v61 }
  0xd7   :  { %643 = vmatpush.msrb.mxu3 %v1566_v9  ;;  %v199_v3 = vpop.f32.mrf.mxu3 }
  0xd8   :  { %481 = vmatpush.msra.mxu2 %v2367_v13  ;;  %575 = vmatpush.msrb.mxu1 %v1783_v63  ;;  %v2050_v13 = vld [vmem:[#allocation2 + $0x1c8] sm:$0xff] }
  0xd9   :  { %644 = vmatpush.msrb.mxu3 %v2369_v17 }
  0xda   :  { %482 = vmatpush.msra.mxu2 %v2368_v15  ;;  %576 = vmatpush.msrb.mxu1 %v1789_v35 }
  0xdb   :  { %645 = vmatpush.msrb.mxu3 %v2370_v20 }
  0xdd   :  { %646 = vmatpush.msrb.mxu3 %v2371_v23 }
 0x138   :  { %v275_v21 = vpop.f32.mrf.mxu1 }
 0x139   :  { %v276_v22 = vadd.f32 %v275_v21, %v255_v18 }
 0x13b   :  { %v278_v1 = vadd.f32 %v1901_v19, %v276_v22 }
 0x13d   :  { %1330 = vtanh.f32 %v278_v1 }
 0x13e   :  { %v179_v5 = vpop.f32.mrf.mxu2 }
 0x13f   :  { %v200_v24 = vadd.f32 %v199_v3, %v179_v5  ;;  %v2056_v5 = vld [vmem:[#allocation2 + $0xd8] sm:$0xff] }
 0x141   :  { %v202_v7 = vadd.f32 %v1823_v28, %v200_v24  ;;  %v2058_v24 = vld [vmem:[#allocation2 + $0x58] sm:$0xff] }
 0x142   :  { %2375 = vst [vmem:[#allocation22_spill] sm:$0xff] %v2058_v24 }
 0x143   :  { %v1331_v9 = vpop.eup %1330  ;;  %1332 = vtanh.f32 %v202_v7  ;;  %v2060_v7 = vld [vmem:[#allocation2 + $0x1c0] sm:$0xff] }
 0x144   :  { %280 = vst [vmem:[#allocation9] sm:$0xff] %v1331_v9  ;;  %405 = vmatmul.f32.vlgmr.msra.gmra.mxu0 %v1331_v9  ;;  %v2064_v9 = vld [vmem:[#allocation2 + $0x158] sm:$0xff] }
 0x145   :  { %693 = vmatpush.msra.mxu0 %v1660_v33  ;;  %v1951_v33 = vld [vmem:[#allocation2 + $0x38] sm:$0xff] }
 0x146   :  { %647 = vmatpush.msrb.mxu3 %v1951_v33 }
 0x147   :  { %694 = vmatpush.msra.mxu0 %v1669_v36  ;;  %v1961_v36 = vld [vmem:[#allocation2 + $0xa8] sm:$0xff] }
 0x149   :  { %v1333_v25 = vpop.eup %1332  ;;  %695 = vmatpush.msra.mxu0 %v1675_v38  ;;  %v1967_v38 = vld [vmem:[#allocation2 + $0xa0] sm:$0xff] }
 0x14a   :  { %331 = vmatmul.f32.vlgmr.msrb.gmra.mxu2 %v1333_v25  ;;  %425 = vmatmul.f32.vlgmr.msra.gmra.mxu1 %v1333_v25  ;;  %v2066_v25 = vld [vmem:[#allocation2 + $0xd0] sm:$0xff] }
 0x14b   :  { %619 = vmatpush.msrb.mxu2 %v1538_v0  ;;  %696 = vmatpush.msra.mxu0 %v1683_v40  ;;  %v434_v0 = vld [vmem:[#allocation4 + $0x18] sm:$0xff] }
 0x14c   :  { %713 = vmatpush.msra.mxu1 %v1662_v34  ;;  %503 = vmatmul.f32.vlgmr.msra.gmra.mxu3 %v434_v0  ;;  %v1955_v34 = vld [vmem:[#allocation2 + $0xb0] sm:$0xff]  ;;  %v1973_v40 = vld [vmem:[#allocation2 + $0x98] sm:$0xff] }
 0x14d   :  { %620 = vmatpush.msrb.mxu2 %v1542_v2  ;;  %697 = vmatpush.msra.mxu0 %v1691_v42  ;;  %v1979_v42 = vld [vmem:[#allocation2 + $0x90] sm:$0xff] }
 0x14e   :  { %714 = vmatpush.msra.mxu1 %v1671_v37  ;;  %v1963_v37 = vld [vmem:[#allocation2 + $0x28] sm:$0xff]  ;;  %v2068_v0 = vld [vmem:[#allocation2 + $0x50] sm:$0xff] }
 0x14f   :  { %621 = vmatpush.msrb.mxu2 %v1548_v4  ;;  %698 = vmatpush.msra.mxu0 %v1699_v44  ;;  %v1983_v44 = vld [vmem:[#allocation2 + $0x88] sm:$0xff] }
 0x150   :  { %715 = vmatpush.msra.mxu1 %v1677_v39  ;;  %v1969_v39 = vld [vmem:[#allocation2 + $0x20] sm:$0xff] }
 0x151   :  { %622 = vmatpush.msrb.mxu2 %v1556_v6  ;;  %699 = vmatpush.msra.mxu0 %v1707_v46  ;;  %v1989_v46 = vld [vmem:[#allocation2 + $0x80] sm:$0xff] }
 0x152   :  { %716 = vmatpush.msra.mxu1 %v1685_v41  ;;  %v1975_v41 = vld [vmem:[#allocation2 + $0x18] sm:$0xff] }
 0x153   :  { %623 = vmatpush.msrb.mxu2 %v1564_v8  ;;  %700 = vmatpush.msra.mxu0 %v1715_v48  ;;  %2372 = vst [vmem:[#allocation24_spill] sm:$0xff] %v1975_v41  ;;  %v586_v48 = vld [vmem:[#allocation4 + $0x20] sm:$0xff] }
 0x154   :  { %717 = vmatpush.msra.mxu1 %v1693_v43  ;;  %v1981_v43 = vld [vmem:[#allocation2 + $0x10] sm:$0xff] }
 0x155   :  { %624 = vmatpush.msrb.mxu2 %v1572_v10  ;;  %701 = vmatpush.msra.mxu0 %v1723_v50  ;;  %v352_v10 = vpop.f32.mrf.mxu3  ;;  %2373 = vst [vmem:[#allocation25_spill] sm:$0xff] %v1981_v43  ;;  %v1999_v50 = vld [vmem:[#allocation2 + $0x1f0] sm:$0xff] }
 0x156   :  { %718 = vmatpush.msra.mxu1 %v1701_v45  ;;  %v1987_v45 = vld [vmem:[#allocation2 + $0x8] sm:$0xff] }
 0x157   :  { %625 = vmatpush.msrb.mxu2 %v1580_v12  ;;  %702 = vmatpush.msra.mxu0 %v1731_v52  ;;  %v2004_v52 = vld [vmem:[#allocation2 + $0xf8] sm:$0xff] }
 0x158   :  { %719 = vmatpush.msra.mxu1 %v1709_v47  ;;  %v1991_v47 = vld [vmem:[#allocation2] sm:$0xff] }
 0x159   :  { %626 = vmatpush.msrb.mxu2 %v1588_v14  ;;  %703 = vmatpush.msra.mxu0 %v1759_v54  ;;  %v2010_v54 = vld [vmem:[#allocation2 + $0x178] sm:$0xff] }
 0x15a   :  { %720 = vmatpush.msra.mxu1 %v1717_v49  ;;  %v1997_v49 = vld [vmem:[#allocation2 + $0x1f8] sm:$0xff] }
 0x15b   :  { %704 = vmatpush.msra.mxu0 %v1765_v56  ;;  %627 = vmatpush.msrb.mxu2 %v1949_v31  ;;  %v2014_v56 = vld [vmem:[#allocation2 + $0x70] sm:$0xff] }
 0x15c   :  { %721 = vmatpush.msra.mxu1 %v1725_v51  ;;  %v2002_v51 = vld [vmem:[#allocation2 + $0x1e8] sm:$0xff] }
 0x15d   :  { %705 = vmatpush.msra.mxu0 %v1771_v58  ;;  %628 = vmatpush.msrb.mxu2 %v1955_v34  ;;  %v2020_v58 = vld [vmem:[#allocation2 + $0xe8] sm:$0xff] }
 0x15e   :  { %722 = vmatpush.msra.mxu1 %v1733_v53  ;;  %v2006_v53 = vld [vmem:[#allocation2 + $0x78] sm:$0xff] }
 0x15f   :  { %706 = vmatpush.msra.mxu0 %v1777_v60  ;;  %629 = vmatpush.msrb.mxu2 %v1961_v36  ;;  %v2026_v60 = vld [vmem:[#allocation2 + $0x68] sm:$0xff] }
 0x160   :  { %723 = vmatpush.msra.mxu1 %v1761_v55  ;;  %v2012_v55 = vld [vmem:[#allocation2 + $0xf0] sm:$0xff] }
 0x161   :  { %707 = vmatpush.msra.mxu0 %v1781_v62  ;;  %630 = vmatpush.msrb.mxu2 %v1967_v38  ;;  %v2032_v62 = vld [vmem:[#allocation2 + $0xe0] sm:$0xff] }
 0x162   :  { %724 = vmatpush.msra.mxu1 %v1767_v57  ;;  %v2018_v57 = vld [vmem:[#allocation2 + $0x170] sm:$0xff] }
 0x163   :  { %708 = vmatpush.msra.mxu0 %v1787_v32  ;;  %631 = vmatpush.msrb.mxu2 %v1973_v40  ;;  %v2036_v32 = vld [vmem:[#allocation2 + $0x1d8] sm:$0xff] }
 0x164   :  { %725 = vmatpush.msra.mxu1 %v1773_v59  ;;  %v2022_v59 = vld [vmem:[#allocation2 + $0x1e0] sm:$0xff] }
 0x165   :  { %632 = vmatpush.msrb.mxu2 %v1979_v42 }
 0x166   :  { %726 = vmatpush.msra.mxu1 %v1779_v61  ;;  %v2028_v61 = vld [vmem:[#allocation2 + $0x168] sm:$0xff] }
 0x167   :  { %633 = vmatpush.msrb.mxu2 %v1983_v44 }
 0x168   :  { %727 = vmatpush.msra.mxu1 %v1783_v63  ;;  %v2034_v63 = vld [vmem:[#allocation2 + $0x60] sm:$0xff] }
 0x169   :  { %634 = vmatpush.msrb.mxu2 %v1989_v46 }
 0x16a   :  { %728 = vmatpush.msra.mxu1 %v1789_v35  ;;  %v1957_v35 = vld [vmem:[#allocation2 + $0x30] sm:$0xff] }
 0x16b   :  { %648 = vmatpush.msrb.mxu3 %v1957_v35 }
 0x16d   :  { %649 = vmatpush.msrb.mxu3 %v1963_v37 }
 0x16f   :  { %650 = vmatpush.msrb.mxu3 %v1969_v39 }
 0x171   :  { %651 = vmatpush.msrb.mxu3 %v1975_v41 }
 0x173   :  { %652 = vmatpush.msrb.mxu3 %v1981_v43 }
 0x175   :  { %653 = vmatpush.msrb.mxu3 %v1987_v45 }
 0x177   :  { %654 = vmatpush.msrb.mxu3 %v1991_v47 }
 0x178   :  { %655 = vmatmul.f32.vlgmr.msrb.gmra.mxu3 %v586_v48  ;;  %v2104_v48 = vld [vmem:[#allocation2 + $0x1a0] sm:$0xff] }
 0x179   :  { %791 = vmatpush.msra.mxu3 %v2006_v53 }
 0x17b   :  { %792 = vmatpush.msra.mxu3 %v2014_v56 }
 0x17d   :  { %793 = vmatpush.msra.mxu3 %v2026_v60 }
 0x17f   :  { %794 = vmatpush.msra.mxu3 %v2034_v63 }
 0x181   :  { %795 = vmatpush.msra.mxu3 %v2058_v24 }
 0x183   :  { %796 = vmatpush.msra.mxu3 %v2068_v0 }
 0x1c1   :  { %v406_v2 = vpop.f32.mrf.mxu0 }
 0x1c7   :  { %v426_v4 = vpop.f32.mrf.mxu1 }
 0x1c8   :  { %v427_v6 = vadd.f32 %v426_v4, %v406_v2  ;;  %v2072_v2 = vld [vmem:[#allocation2 + $0x1b8] sm:$0xff]  ;;  %v2074_v4 = vld [vmem:[#allocation2 + $0x150] sm:$0xff] }
 0x1c9   :  { %2376 = vst [vmem:[#allocation23_spill] sm:$0xff] %v2074_v4 }
 0x1ca   :  { %v429_v8 = vadd.f32 %v1901_v19, %v427_v6  ;;  %v2076_v6 = vld [vmem:[#allocation2 + $0xc8] sm:$0xff] }
 0x1cb   :  { %2377 = vst [vmem:[#allocation26_spill] sm:$0xff] %v2076_v6 }
 0x1cc   :  { %1334 = vtanh.f32 %v429_v8  ;;  %v2080_v8 = vld [vmem:[#allocation2 + $0x48] sm:$0xff] }
 0x1cd   :  { %v332_v12 = vpop.f32.mrf.mxu2  ;;  %797 = vmatpush.msra.mxu3 %v2080_v8 }
 0x1ce   :  { %v353_v14 = vadd.f32 %v352_v10, %v332_v12  ;;  %v2082_v10 = vld [vmem:[#allocation2 + $0x1b0] sm:$0xff]  ;;  %v2084_v12 = vld [vmem:[#allocation2 + $0x148] sm:$0xff] }
 0x1cf   :  { %v504_v20 = vpop.f32.mrf.mxu3 }
 0x1d0   :  { %v355_v26 = vadd.f32 %v1823_v28, %v353_v14  ;;  %v2092_v14 = vld [vmem:[#allocation2 + $0xc0] sm:$0xff] }
 0x1d2   :  { %v1335_v27 = vpop.eup %1334  ;;  %1336 = vtanh.f32 %v355_v26  ;;  %v2094_v26 = vld [vmem:[#allocation2 + $0x40] sm:$0xff] }
 0x1d3   :  { %432 = vst [vmem:[#allocation9 + $0x8] sm:$0xff] %v1335_v27  ;;  %557 = vmatmul.f32.vlgmr.msrb.gmra.mxu0 %v1335_v27  ;;  %v2096_v27 = vld [vmem:[#allocation2 + $0x1a8] sm:$0xff]  ;;  %798 = vmatpush.msra.mxu3 %v2094_v26 }
 0x1d4   :  { %845 = vmatpush.msrb.mxu0 %v1997_v49 }
 0x1d5   :  { %799 = vmatpush.msra.mxu3 %v1951_v33 }
 0x1d6   :  { %846 = vmatpush.msrb.mxu0 %v1999_v50 }
 0x1d7   :  { %800 = vmatpush.msra.mxu3 %v1957_v35 }
 0x1d8   :  { %v1337_v29 = vpop.eup %1336  ;;  %847 = vmatpush.msrb.mxu0 %v2002_v51 }
 0x1d9   :  { %483 = vmatmul.f32.vlgmr.msra.gmra.mxu2 %v1337_v29  ;;  %577 = vmatmul.f32.vlgmr.msrb.gmra.mxu1 %v1337_v29  ;;  %v2100_v29 = vld [vmem:[#allocation2 + $0x140] sm:$0xff] }
 0x1da   :  { %771 = vmatpush.msra.mxu2 %v2004_v52  ;;  %865 = vmatpush.msrb.mxu1 %v2010_v54 }
 0x1db   :  { %848 = vmatpush.msrb.mxu0 %v2022_v59  ;;  %801 = vmatpush.msra.mxu3 %v1963_v37 }
 0x1dc   :  { %772 = vmatpush.msra.mxu2 %v2012_v55  ;;  %866 = vmatpush.msrb.mxu1 %v2018_v57 }
 0x1dd   :  { %849 = vmatpush.msrb.mxu0 %v2036_v32  ;;  %802 = vmatpush.msra.mxu3 %v1969_v39 }
 0x1de   :  { %773 = vmatpush.msra.mxu2 %v2020_v58  ;;  %867 = vmatpush.msrb.mxu1 %v2028_v61 }
 0x1df   :  { %850 = vmatpush.msrb.mxu0 %v2044_v11  ;;  %803 = vmatpush.msra.mxu3 %v1975_v41  ;;  %v2154_v41 = vld [vmem:[#allocation2 + $0x100] sm:$0xff] }
 0x1e0   :  { %774 = vmatpush.msra.mxu2 %v2032_v62  ;;  %868 = vmatpush.msrb.mxu1 %v2040_v30 }
 0x1e1   :  { %851 = vmatpush.msrb.mxu0 %v2050_v13  ;;  %804 = vmatpush.msra.mxu3 %v1981_v43  ;;  %v738_v43 = vld [vmem:[#allocation4 + $0x28] sm:$0xff] }
 0x1e2   :  { %775 = vmatpush.msra.mxu2 %v2056_v5  ;;  %869 = vmatpush.msrb.mxu1 %v2064_v9 }
 0x1e3   :  { %852 = vmatpush.msrb.mxu0 %v2060_v7  ;;  %805 = vmatpush.msra.mxu3 %v1987_v45 }
 0x1e4   :  { %776 = vmatpush.msra.mxu2 %v2066_v25  ;;  %870 = vmatpush.msrb.mxu1 %v2074_v4 }
 0x1e5   :  { %853 = vmatpush.msrb.mxu0 %v2072_v2  ;;  %806 = vmatpush.msra.mxu3 %v1991_v47 }
 0x1e6   :  { %777 = vmatpush.msra.mxu2 %v2076_v6  ;;  %871 = vmatpush.msrb.mxu1 %v2084_v12 }
 0x1e7   :  { %854 = vmatpush.msrb.mxu0 %v2082_v10  ;;  %807 = vmatmul.f32.vlgmr.msra.gmra.mxu3 %v738_v43 }
 0x1e8   :  { %778 = vmatpush.msra.mxu2 %v2092_v14  ;;  %872 = vmatpush.msrb.mxu1 %v2100_v29 }
 0x1e9   :  { %855 = vmatpush.msrb.mxu0 %v2096_v27  ;;  %943 = vmatpush.msrb.mxu3 %v2006_v53 }
 0x1ea   :  { %779 = vmatpush.msra.mxu2 %v1949_v31 }
 0x1eb   :  { %856 = vmatpush.msrb.mxu0 %v2104_v48  ;;  %944 = vmatpush.msrb.mxu3 %v2014_v56 }
 0x1ec   :  { %780 = vmatpush.msra.mxu2 %v1955_v34 }
 0x1ed   :  { %945 = vmatpush.msrb.mxu3 %v2026_v60 }
 0x1ee   :  { %781 = vmatpush.msra.mxu2 %v1961_v36 }
 0x1ef   :  { %946 = vmatpush.msrb.mxu3 %v2034_v63 }
 0x1f0   :  { %782 = vmatpush.msra.mxu2 %v1967_v38 }
 0x1f1   :  { %947 = vmatpush.msrb.mxu3 %v2058_v24 }
 0x1f2   :  { %783 = vmatpush.msra.mxu2 %v1973_v40 }
 0x1f3   :  { %948 = vmatpush.msrb.mxu3 %v2068_v0 }
 0x1f4   :  { %784 = vmatpush.msra.mxu2 %v1979_v42 }
 0x1f5   :  { %949 = vmatpush.msrb.mxu3 %v2080_v8 }
 0x1f6   :  { %785 = vmatpush.msra.mxu2 %v1983_v44 }
 0x1f7   :  { %950 = vmatpush.msrb.mxu3 %v2094_v26 }
 0x1f8   :  { %786 = vmatpush.msra.mxu2 %v1989_v46 }
 0x1f9   :  { %951 = vmatpush.msrb.mxu3 %v1951_v33 }
 0x1fb   :  { %952 = vmatpush.msrb.mxu3 %v1957_v35 }
 0x1fd   :  { %953 = vmatpush.msrb.mxu3 %v1963_v37 }
 0x1ff   :  { %954 = vmatpush.msrb.mxu3 %v1969_v39 }
 0x250   :  { %v558_v15 = vpop.f32.mrf.mxu0 }
 0x256   :  { %v578_v16 = vpop.f32.mrf.mxu1 }
 0x257   :  { %v579_v17 = vadd.f32 %v578_v16, %v558_v15  ;;  %v2106_v15 = vld [vmem:[#allocation2 + $0x138] sm:$0xff] }
 0x258   :  { %873 = vmatpush.msrb.mxu1 %v2106_v15  ;;  %v2112_v16 = vld [vmem:[#allocation2 + $0x198] sm:$0xff] }
 0x259   :  { %v581_v18 = vadd.f32 %v1901_v19, %v579_v17  ;;  %v2114_v17 = vld [vmem:[#allocation2 + $0x130] sm:$0xff]  ;;  %857 = vmatpush.msrb.mxu0 %v2112_v16 }
 0x25a   :  { %874 = vmatpush.msrb.mxu1 %v2114_v17 }
 0x25b   :  { %1338 = vtanh.f32 %v581_v18  ;;  %v2120_v18 = vld [vmem:[#allocation2 + $0x190] sm:$0xff] }
 0x25c   :  { %v484_v21 = vpop.f32.mrf.mxu2  ;;  %858 = vmatpush.msrb.mxu0 %v2120_v18 }
 0x25d   :  { %v505_v22 = vadd.f32 %v504_v20, %v484_v21  ;;  %v2122_v20 = vld [vmem:[#allocation2 + $0x128] sm:$0xff] }
 0x25e   :  { %875 = vmatpush.msrb.mxu1 %v2122_v20  ;;  %v2128_v21 = vld [vmem:[#allocation2 + $0x188] sm:$0xff] }
 0x25f   :  { %v507_v23 = vadd.f32 %v1823_v28, %v505_v22  ;;  %2378 = vst [vmem:[#allocation27_spill] sm:$0xff] %v2128_v21  ;;  %v2130_v22 = vld [vmem:[#allocation2 + $0x120] sm:$0xff]  ;;  %859 = vmatpush.msrb.mxu0 %v2128_v21  ;;  %v2148_v21 = vld [vmem:[#allocation2 + $0x108] sm:$0xff] }
 0x260   :  { %876 = vmatpush.msrb.mxu1 %v2130_v22 }
 0x261   :  { %v1339_v1 = vpop.eup %1338  ;;  %1340 = vtanh.f32 %v507_v23  ;;  %v2136_v23 = vld [vmem:[#allocation2 + $0x180] sm:$0xff] }
 0x262   :  { %584 = vst [vmem:[#allocation9 + $0x10] sm:$0xff] %v1339_v1  ;;  %709 = vmatmul.f32.vlgmr.msra.gmra.mxu0 %v1339_v1  ;;  %v2138_v1 = vld [vmem:[#allocation2 + $0x118] sm:$0xff] }
 0x263   :  { %860 = vmatpush.msrb.mxu0 %v2136_v23  ;;  %877 = vmatpush.msrb.mxu1 %v2138_v1 }
 0x265   :  { %997 = vmatpush.msra.mxu0 %v1997_v49 }
 0x267   :  { %v1341_v3 = vpop.eup %1340  ;;  %998 = vmatpush.msra.mxu0 %v1999_v50 }
 0x268   :  { %635 = vmatmul.f32.vlgmr.msrb.gmra.mxu2 %v1341_v3  ;;  %729 = vmatmul.f32.vlgmr.msra.gmra.mxu1 %v1341_v3  ;;  %v2144_v3 = vld [vmem:[#allocation2 + $0x110] sm:$0xff] }
 0x269   :  { %878 = vmatpush.msrb.mxu1 %v2144_v3  ;;  %999 = vmatpush.msra.mxu0 %v2002_v51 }
 0x26a   :  { %923 = vmatpush.msrb.mxu2 %v2004_v52 }
 0x26b   :  { %879 = vmatpush.msrb.mxu1 %v2148_v21  ;;  %1000 = vmatpush.msra.mxu0 %v2022_v59 }
 0x26c   :  { %924 = vmatpush.msrb.mxu2 %v2012_v55 }
 0x26d   :  { %880 = vmatpush.msrb.mxu1 %v2154_v41  ;;  %1001 = vmatpush.msra.mxu0 %v2036_v32 }
 0x26e   :  { %925 = vmatpush.msrb.mxu2 %v2020_v58 }
 0x26f   :  { %1017 = vmatpush.msra.mxu1 %v2010_v54  ;;  %1002 = vmatpush.msra.mxu0 %v2044_v11 }
 0x270   :  { %926 = vmatpush.msrb.mxu2 %v2032_v62 }
 0x271   :  { %1018 = vmatpush.msra.mxu1 %v2018_v57  ;;  %1003 = vmatpush.msra.mxu0 %v2050_v13 }
 0x272   :  { %927 = vmatpush.msrb.mxu2 %v2056_v5 }
 0x273   :  { %1019 = vmatpush.msra.mxu1 %v2028_v61  ;;  %1004 = vmatpush.msra.mxu0 %v2060_v7 }
 0x274   :  { %928 = vmatpush.msrb.mxu2 %v2066_v25 }
 0x275   :  { %1020 = vmatpush.msra.mxu1 %v2040_v30  ;;  %1005 = vmatpush.msra.mxu0 %v2072_v2 }
 0x276   :  { %929 = vmatpush.msrb.mxu2 %v2076_v6  ;;  %v656_v6 = vpop.f32.mrf.mxu3 }
 0x277   :  { %1021 = vmatpush.msra.mxu1 %v2064_v9  ;;  %1006 = vmatpush.msra.mxu0 %v2082_v10 }
 0x278   :  { %930 = vmatpush.msrb.mxu2 %v2092_v14 }
 0x279   :  { %1022 = vmatpush.msra.mxu1 %v2074_v4  ;;  %1007 = vmatpush.msra.mxu0 %v2096_v27 }
 0x27a   :  { %931 = vmatpush.msrb.mxu2 %v1949_v31 }
 0x27b   :  { %1023 = vmatpush.msra.mxu1 %v2084_v12  ;;  %1008 = vmatpush.msra.mxu0 %v2104_v48 }
 0x27c   :  { %932 = vmatpush.msrb.mxu2 %v1955_v34 }
 0x27d   :  { %1024 = vmatpush.msra.mxu1 %v2100_v29  ;;  %1009 = vmatpush.msra.mxu0 %v2112_v16 }
 0x27e   :  { %933 = vmatpush.msrb.mxu2 %v1961_v36 }
 0x27f   :  { %1025 = vmatpush.msra.mxu1 %v2106_v15  ;;  %1010 = vmatpush.msra.mxu0 %v2120_v18 }
 0x280   :  { %934 = vmatpush.msrb.mxu2 %v1967_v38 }
 0x281   :  { %1026 = vmatpush.msra.mxu1 %v2114_v17 }
 0x282   :  { %935 = vmatpush.msrb.mxu2 %v1973_v40 }
 0x283   :  { %1027 = vmatpush.msra.mxu1 %v2122_v20 }
 0x284   :  { %936 = vmatpush.msrb.mxu2 %v1979_v42 }
 0x285   :  { %1028 = vmatpush.msra.mxu1 %v2130_v22 }
 0x286   :  { %937 = vmatpush.msrb.mxu2 %v1983_v44 }
 0x287   :  { %1029 = vmatpush.msra.mxu1 %v2138_v1 }
 0x288   :  { %938 = vmatpush.msrb.mxu2 %v1989_v46 }
 0x289   :  { %1030 = vmatpush.msra.mxu1 %v2144_v3 }
 0x28b   :  { %1031 = vmatpush.msra.mxu1 %v2148_v21 }
 0x28d   :  { %1032 = vmatpush.msra.mxu1 %v2154_v41 }
 0x2df   :  { %v710_v43 = vpop.f32.mrf.mxu0 }
 0x2e5   :  { %v730_v30 = vpop.f32.mrf.mxu1 }
 0x2e6   :  { %v731_v24 = vadd.f32 %v730_v30, %v710_v43 }
 0x2e8   :  { %v733_v4 = vadd.f32 %v1901_v19, %v731_v24 }
 0x2ea   :  { %1342 = vtanh.f32 %v733_v4 }
 0x2eb   :  { %v636_v30 = vpop.f32.mrf.mxu2 }
 0x2ec   :  { %v657_v24 = vadd.f32 %v656_v6, %v636_v30  ;;  %v2379_v6 = vld [vmem:[#allocation27_spill] sm:$0xff]  ;;  %v2380_v30 = vld [vmem:[#allocation24_spill] sm:$0xff] }
 0x2ed   :  { %1011 = vmatpush.msra.mxu0 %v2379_v6  ;;  %955 = vmatpush.msrb.mxu3 %v2380_v30 }
 0x2ee   :  { %v659_v4 = vadd.f32 %v1823_v28, %v657_v24  ;;  %v2381_v24 = vld [vmem:[#allocation25_spill] sm:$0xff] }
 0x2ef   :  { %1012 = vmatpush.msra.mxu0 %v2136_v23  ;;  %956 = vmatpush.msrb.mxu3 %v2381_v24 }
 0x2f0   :  { %v1343_v43 = vpop.eup %1342  ;;  %1344 = vtanh.f32 %v659_v4 }
 0x2f1   :  { %736 = vst [vmem:[#allocation9 + $0x18] sm:$0xff] %v1343_v43  ;;  %861 = vmatmul.f32.vlgmr.msrb.gmra.mxu0 %v1343_v43  ;;  %957 = vmatpush.msrb.mxu3 %v1987_v45 }
 0x2f2   :  { %1149 = vmatpush.msrb.mxu0 %v1997_v49 }
 0x2f3   :  { %958 = vmatpush.msrb.mxu3 %v1991_v47 }
 0x2f4   :  { %1150 = vmatpush.msrb.mxu0 %v1999_v50 }
 0x2f5   :  { %1095 = vmatpush.msra.mxu3 %v2006_v53  ;;  %v2383_v53 = vld [vmem:[#allocation22_spill] sm:$0xff] }
 0x2f6   :  { %v1345_v4 = vpop.eup %1344  ;;  %1151 = vmatpush.msrb.mxu0 %v2002_v51 }
 0x2f7   :  { %787 = vmatmul.f32.vlgmr.msra.gmra.mxu2 %v1345_v4  ;;  %881 = vmatmul.f32.vlgmr.msrb.gmra.mxu1 %v1345_v4 }
 0x2f8   :  { %1075 = vmatpush.msra.mxu2 %v2004_v52  ;;  %1152 = vmatpush.msrb.mxu0 %v2022_v59  ;;  %v2382_v52 = vld [vmem:[#allocation21_spill] sm:$0xff] }
 0x2f9   :  { %1169 = vmatpush.msrb.mxu1 %v2010_v54  ;;  %1096 = vmatpush.msra.mxu3 %v2014_v56  ;;  %v2385_v56 = vld [vmem:[#allocation26_spill] sm:$0xff] }
 0x2fa   :  { %1076 = vmatpush.msra.mxu2 %v2012_v55  ;;  %1153 = vmatpush.msrb.mxu0 %v2036_v32  ;;  %v2384_v55 = vld [vmem:[#allocation23_spill] sm:$0xff] }
 0x2fb   :  { %1170 = vmatpush.msrb.mxu1 %v2018_v57  ;;  %1097 = vmatpush.msra.mxu3 %v2026_v60 }
 0x2fc   :  { %1077 = vmatpush.msra.mxu2 %v2020_v58  ;;  %1154 = vmatpush.msrb.mxu0 %v2044_v11 }
 0x2fd   :  { %1171 = vmatpush.msrb.mxu1 %v2028_v61  ;;  %1098 = vmatpush.msra.mxu3 %v2034_v63 }
 0x2fe   :  { %1078 = vmatpush.msra.mxu2 %v2032_v62  ;;  %1155 = vmatpush.msrb.mxu0 %v2050_v13 }
 0x2ff   :  { %1172 = vmatpush.msrb.mxu1 %v2382_v52  ;;  %1099 = vmatpush.msra.mxu3 %v2383_v53 }
 0x300   :  { %1079 = vmatpush.msra.mxu2 %v2056_v5  ;;  %1156 = vmatpush.msrb.mxu0 %v2060_v7 }
 0x301   :  { %1173 = vmatpush.msrb.mxu1 %v2064_v9  ;;  %1100 = vmatpush.msra.mxu3 %v2068_v0 }
 0x302   :  { %1080 = vmatpush.msra.mxu2 %v2066_v25  ;;  %1157 = vmatpush.msrb.mxu0 %v2072_v2 }
 0x303   :  { %1174 = vmatpush.msrb.mxu1 %v2384_v55  ;;  %1101 = vmatpush.msra.mxu3 %v2080_v8 }
 0x304   :  { %1081 = vmatpush.msra.mxu2 %v2385_v56  ;;  %1158 = vmatpush.msrb.mxu0 %v2082_v10 }
 0x305   :  { %1175 = vmatpush.msrb.mxu1 %v2084_v12  ;;  %1102 = vmatpush.msra.mxu3 %v2094_v26 }
 0x306   :  { %1082 = vmatpush.msra.mxu2 %v2092_v14  ;;  %1159 = vmatpush.msrb.mxu0 %v2096_v27 }
 0x307   :  { %1176 = vmatpush.msrb.mxu1 %v2100_v29  ;;  %1103 = vmatpush.msra.mxu3 %v1951_v33 }
 0x308   :  { %1083 = vmatpush.msra.mxu2 %v1949_v31  ;;  %1160 = vmatpush.msrb.mxu0 %v2104_v48  ;;  %v890_v31 = vld [vmem:[#allocation4 + $0x30] sm:$0xff] }
 0x309   :  { %1177 = vmatpush.msrb.mxu1 %v2106_v15  ;;  %1104 = vmatpush.msra.mxu3 %v1957_v35 }
 0x30a   :  { %1084 = vmatpush.msra.mxu2 %v1955_v34  ;;  %1161 = vmatpush.msrb.mxu0 %v2112_v16 }
 0x30b   :  { %1178 = vmatpush.msrb.mxu1 %v2114_v17  ;;  %1105 = vmatpush.msra.mxu3 %v1963_v37  ;;  %v808_v37 = vpop.f32.mrf.mxu3 }
 0x30c   :  { %1085 = vmatpush.msra.mxu2 %v1961_v36  ;;  %1162 = vmatpush.msrb.mxu0 %v2120_v18 }
 0x30d   :  { %1179 = vmatpush.msrb.mxu1 %v2122_v20  ;;  %1106 = vmatpush.msra.mxu3 %v1969_v39 }
 0x30e   :  { %1086 = vmatpush.msra.mxu2 %v1967_v38  ;;  %1163 = vmatpush.msrb.mxu0 %v2379_v6 }
 0x30f   :  { %1180 = vmatpush.msrb.mxu1 %v2130_v22  ;;  %1107 = vmatpush.msra.mxu3 %v2380_v30 }
 0x310   :  { %1087 = vmatpush.msra.mxu2 %v1973_v40  ;;  %1164 = vmatpush.msrb.mxu0 %v2136_v23 }
 0x311   :  { %1181 = vmatpush.msrb.mxu1 %v2138_v1  ;;  %1108 = vmatpush.msra.mxu3 %v2381_v24 }
 0x312   :  { %1088 = vmatpush.msra.mxu2 %v1979_v42  ;;  %959 = vmatmul.f32.vlgmr.msrb.gmra.mxu3 %v890_v31 }
 0x313   :  { %1182 = vmatpush.msrb.mxu1 %v2144_v3  ;;  %1109 = vmatpush.msra.mxu3 %v1987_v45 }
 0x314   :  { %1089 = vmatpush.msra.mxu2 %v1983_v44 }
 0x315   :  { %1183 = vmatpush.msrb.mxu1 %v2148_v21  ;;  %1110 = vmatpush.msra.mxu3 %v1991_v47 }
 0x316   :  { %1090 = vmatpush.msra.mxu2 %v1989_v46 }
 0x317   :  { %1184 = vmatpush.msrb.mxu1 %v2154_v41  ;;  %1245 = vmatpush.msrb.mxu3 %v2010_v54  ;;  %v1360_v54 = vld [vmem:[#allocation7] ss:$0 sm:$0xff] }
 0x319   :  { %1246 = vmatpush.msrb.mxu3 %v2018_v57 }
 0x31b   :  { %1247 = vmatpush.msrb.mxu3 %v2028_v61 }
 0x31d   :  { %1248 = vmatpush.msrb.mxu3 %v2382_v52 }
 0x31f   :  { %1249 = vmatpush.msrb.mxu3 %v2064_v9 }
 0x321   :  { %1250 = vmatpush.msrb.mxu3 %v2384_v55 }
 0x323   :  { %1251 = vmatpush.msrb.mxu3 %v2084_v12 }
 0x325   :  { %1252 = vmatpush.msrb.mxu3 %v2100_v29 }
 0x327   :  { %1253 = vmatpush.msrb.mxu3 %v2106_v15 }
 0x329   :  { %1254 = vmatpush.msrb.mxu3 %v2114_v17 }
 0x32b   :  { %1255 = vmatpush.msrb.mxu3 %v2122_v20 }
 0x32d   :  { %1256 = vmatpush.msrb.mxu3 %v2130_v22 }
 0x32f   :  { %1257 = vmatpush.msrb.mxu3 %v2138_v1 }
 0x331   :  { %1258 = vmatpush.msrb.mxu3 %v2144_v3 }
 0x333   :  { %1259 = vmatpush.msrb.mxu3 %v2148_v21 }
 0x335   :  { %1260 = vmatpush.msrb.mxu3 %v2154_v41 }
 0x36e   :  { %v862_v33 = vpop.f32.mrf.mxu0 }
 0x374   :  { %v882_v34 = vpop.f32.mrf.mxu1 }
 0x375   :  { %v883_v35 = vadd.f32 %v882_v34, %v862_v33 }
 0x377   :  { %v885_v36 = vadd.f32 %v1901_v19, %v883_v35 }
 0x379   :  { %1346 = vtanh.f32 %v885_v36 }
 0x37a   :  { %v788_v38 = vpop.f32.mrf.mxu2 }
 0x37b   :  { %v809_v39 = vadd.f32 %v808_v37, %v788_v38 }
 0x37d   :  { %v811_v40 = vadd.f32 %v1823_v28, %v809_v39  ;;  %v1042_v28 = vld [vmem:[#allocation4 + $0x38] sm:$0xff] }
 0x37e   :  { %1111 = vmatmul.f32.vlgmr.msra.gmra.mxu3 %v1042_v28 }
 0x37f   :  { %v1347_v42 = vpop.eup %1346  ;;  %1348 = vtanh.f32 %v811_v40 }
 0x380   :  { %888 = vst [vmem:[#allocation9 + $0x20] sm:$0xff] %v1347_v42  ;;  %1013 = vmatmul.f32.vlgmr.msra.gmra.mxu0 %v1347_v42 }
 0x385   :  { %v1349_v44 = vpop.eup %1348 }
 0x386   :  { %939 = vmatmul.f32.vlgmr.msrb.gmra.mxu2 %v1349_v44  ;;  %1033 = vmatmul.f32.vlgmr.msra.gmra.mxu1 %v1349_v44 }
 0x387   :  { %1225 = vmatpush.msrb.mxu2 %v1997_v49 }
 0x389   :  { %1226 = vmatpush.msrb.mxu2 %v1999_v50 }
 0x38b   :  { %1227 = vmatpush.msrb.mxu2 %v2002_v51 }
 0x38d   :  { %1228 = vmatpush.msrb.mxu2 %v2022_v59 }
 0x38f   :  { %1229 = vmatpush.msrb.mxu2 %v2036_v32 }
 0x391   :  { %1230 = vmatpush.msrb.mxu2 %v2044_v11 }
 0x393   :  { %1231 = vmatpush.msrb.mxu2 %v2050_v13 }
 0x395   :  { %1232 = vmatpush.msrb.mxu2 %v2060_v7  ;;  %v960_v49 = vpop.f32.mrf.mxu3 }
 0x397   :  { %1233 = vmatpush.msrb.mxu2 %v2072_v2 }
 0x399   :  { %1234 = vmatpush.msrb.mxu2 %v2082_v10 }
 0x39b   :  { %1235 = vmatpush.msrb.mxu2 %v2096_v27 }
 0x39d   :  { %1236 = vmatpush.msrb.mxu2 %v2104_v48 }
 0x39f   :  { %1237 = vmatpush.msrb.mxu2 %v2112_v16 }
 0x3a1   :  { %1238 = vmatpush.msrb.mxu2 %v2120_v18 }
 0x3a3   :  { %1239 = vmatpush.msrb.mxu2 %v2379_v6 }
 0x3a5   :  { %1240 = vmatpush.msrb.mxu2 %v2136_v23 }
 0x3fd   :  { %v1014_v41 = vpop.f32.mrf.mxu0 }
 0x401   :  { %v1112_v32 = vpop.f32.mrf.mxu3 }
 0x403   :  { %v1034_v45 = vpop.f32.mrf.mxu1 }
 0x404   :  { %v1035_v46 = vadd.f32 %v1034_v45, %v1014_v41 }
 0x406   :  { %v1037_v47 = vadd.f32 %v1901_v19, %v1035_v46 }
 0x408   :  { %1350 = vtanh.f32 %v1037_v47 }
 0x409   :  { %v940_v50 = vpop.f32.mrf.mxu2 }
 0x40a   :  { %v961_v51 = vadd.f32 %v960_v49, %v940_v50 }
 0x40c   :  { %v963_v57 = vadd.f32 %v1360_v54, %v961_v51 }
 0x40e   :  { %v1351_v58 = vpop.eup %1350  ;;  %1352 = vtanh.f32 %v963_v57 }
 0x40f   :  { %1040 = vst [vmem:[#allocation9 + $0x28] sm:$0xff] %v1351_v58  ;;  %1165 = vmatmul.f32.vlgmr.msrb.gmra.mxu0 %v1351_v58 }
 0x414   :  { %v1353_v59 = vpop.eup %1352 }
 0x415   :  { %1091 = vmatmul.f32.vlgmr.msra.gmra.mxu2 %v1353_v59  ;;  %1185 = vmatmul.f32.vlgmr.msrb.gmra.mxu1 %v1353_v59 }
 0x48c   :  { %v1166_v60 = vpop.f32.mrf.mxu0 }
 0x492   :  { %v1186_v61 = vpop.f32.mrf.mxu1 }
 0x493   :  { %v1187_v62 = vadd.f32 %v1186_v61, %v1166_v60 }
 0x495   :  { %v1189_v63 = vadd.f32 %v1901_v19, %v1187_v62 }
 0x497   :  { %1354 = vtanh.f32 %v1189_v63 }
 0x498   :  { %v1092_v11 = vpop.f32.mrf.mxu2 }
 0x499   :  { %v1113_v13 = vadd.f32 %v1112_v32, %v1092_v11 }
 0x49b   :  { %v1115_v5 = vadd.f32 %v1360_v54, %v1113_v13 }
 0x49d   :  { %v1355_v7 = vpop.eup %1354  ;;  %1356 = vtanh.f32 %v1115_v5 }
 0x49e   :  { %1192 = vst [vmem:[#allocation9 + $0x30] sm:$0xff] %v1355_v7  ;;  %1241 = vmatmul.f32.vlgmr.msrb.gmra.mxu2 %v1355_v7 }
 0x4a3   :  { %v1357_v9 = vpop.eup %1356 }
 0x4a4   :  { %1269 = vst [vmem:[#allocation10] sm:$0xff] %v1357_v9  ;;  %1261 = vmatmul.f32.vlgmr.msrb.gmra.mxu3 %v1357_v9 }
 0x521   :  { %v1242_v25 = vpop.f32.mrf.mxu2 }
 0x527   :  { %v1262_v0 = vpop.f32.mrf.mxu3 }
 0x528   :  { %v1263_v2 = vadd.f32 %v1262_v0, %v1242_v25 }
 0x52a   :  { %v1265_v8 = vadd.f32 %v1901_v19, %v1263_v2 }
 0x52c   :  { %1358 = vtanh.f32 %v1265_v8 }
 0x532   :  { %v1359_v10 = vpop.eup %1358 }
 0x533   :  { %1268 = vst [vmem:[#allocation9 + $0x38] sm:$0xff] %v1359_v10 }
 0x534   :  { %1270 = vst [vmem:[#allocation10 + $0x8] sm:$0xff] %v1359_v10  ;;  %1283 = dma.vmem_to_hbm [thread:$0]  %s1276_s6, 1024, %s1278_s9, [#allocation6], %s1492_s23, %s1492_s23, %s1493_s24  }
 0x535   :  { %1296 = dma.vmem_to_hbm [thread:$0]  %s1289_s11, 256, %s1291_s14, [#allocation11], %s1492_s23, %s1492_s23, %s1493_s24  }
 0x536   :  { %1487 = dma.done.wait [#allocation6], 1024  }
 0x537   :  { %1488 = vsyncadd [#allocation6], 4294966272 }
 0x538   :  { %1489 = dma.done.wait [#allocation11], 256  }
 0x539   :  { %1490 = vsyncadd [#allocation11], 4294967040 }
 0x53a   :  { %1305 = vsyncpa [#allocation5], 1 }
 0x53b   :  { %1306 = vsyncpa [#allocation8], 1 }
 0x53c   :  { %1307 = vsyncpa [#allocation6], 1 }
 0x53d   :  { %1308 = vsyncpa [#allocation11], 1 }
 0x53e   :  { %1309 = vsyncmov [#allocation3] }
 0x541   :  { %s1310_s3 = vpop.sfrf %1309 }
 0x542   :  { %p1315_p0 = scmp.ne.s32.totalorder %s1310_s3, 0 }
 0x544   :  { %1314 = shalt.err (%p1315_p0)  }

</bundles_post_ra>
